<compile_context>
chip_gen: v5e
topology: v5e:2x2
jax: 0.10.0
libtpu: 0.0.40
codegen_flags: <defaults>
</compile_context>

<pallas_src>
import functools

import jax
import jax.numpy as jnp
from jax.experimental import pallas as pl
from jax.experimental.pallas import tpu as pltpu


# ----------------------------------------------------------------------------
# Pallas kernel: one (batch, spatial-tile) per grid step, channels-first.
# ----------------------------------------------------------------------------
def _graph_reasoning_kernel(a_ref, bp_ref, cp_ref,
                            waT_ref, wa2T_ref,
                            wb1T_ref, wb2T_ref,
                            wc1T_ref, wc2T_ref,
                            wr1T_ref, wr2T_ref,
                            out_ref, *, exact_recip):
    f32 = jnp.float32
    va = wa2T_ref.shape[1]                      # wa2T: [va_out + 2, va_out]

    def mm(w, x):
        # channels-first matmul: [m, k] x [k, TN] -> [m, TN], f32 accumulation.
        return jnp.dot(w, x, preferred_element_type=f32)

    a = a_ref[0]                                # [Ca, TN] (compute dtype)
    cd = a.dtype

    # Fused va_embedding layer-1 + the two gate convs: one matmul.
    h_a = mm(waT_ref[...], a)                                   # [3*va, TN] f32
    gate_b = 1.0 - jax.nn.sigmoid(h_a[va:2 * va, :])            # [va, TN]
    gate_c = 1.0 - jax.nn.sigmoid(h_a[2 * va:3 * va, :])        # [va, TN]
    # wa2 augmented with the folded reweight_ab / reweight_ac 'a' halves:
    # rows [:va] = emb_a, row va = <emb_a, wab_a>, row va+1 = <emb_a, wac_a>.
    emb_a_aug = mm(wa2T_ref[...], jax.nn.relu(h_a[:va, :]).astype(cd))
    emb_a = emb_a_aug[:va, :]                                   # [va, TN] f32
    la_b = emb_a_aug[va:va + 1, :]                              # [1, TN]
    la_c = emb_a_aug[va + 1:va + 2, :]                          # [1, TN]

    def aggregate(p_ref, w1T, w2T, la, gate):
        # p_ref block: [1, K, C_in, TN].  Per-k channels-first matmuls keep
        # TN on lanes everywhere; the folded reweight vector is the extra row
        # (c_out) of w2T, so the logit is a free lane-dense [1, TN] slice.
        # Online softmax over K: only one [c_out, TN] embedding live at a time.
        K = p_ref.shape[1]
        c_out = w2T.shape[1]
        tn = p_ref.shape[3]
        m = jnp.zeros((1, tn), f32)             # logits are relu()'d -> >= 0
        s = jnp.zeros((1, tn), f32)
        acc = jnp.zeros((c_out, tn), f32)
        for k in range(K):                      # static, unrolled
            p_k = p_ref[0, k]                                   # [C_in, TN]
            h = jax.nn.relu(mm(w1T, p_k)).astype(cd)            # [c_out, TN]
            emb_aug = mm(w2T, h)                                # [c_out+1, TN]
            logit = jax.nn.relu(emb_aug[c_out:c_out + 1, :] + la)   # [1, TN]
            m_new = jnp.maximum(m, logit)
            scale = jnp.exp(m - m_new)                          # [1, TN]
            pw = jnp.exp(logit - m_new)                         # [1, TN]
            s = s * scale + pw
            acc = acc * scale + emb_aug[:c_out, :] * pw         # [c_out, TN]
            m = m_new
        if exact_recip:
            inv = 1.0 / s
        else:
            inv = pl.reciprocal(s, approx=True)                 # EUP slot
        return acc * inv * gate                                 # [c_out, TN]

    agg_b = aggregate(bp_ref, wb1T_ref[...], wb2T_ref[...], la_b, gate_b)
    agg_c = aggregate(cp_ref, wc1T_ref[...], wc2T_ref[...], la_c, gate_c)

    # reproject: sigmoid -> 1x1 conv -> relu -> 1x1 conv (channels-first).
    cat = jnp.concatenate([jax.nn.sigmoid(agg_b),
                           jax.nn.sigmoid(agg_c),
                           jax.nn.sigmoid(emb_a)], axis=0).astype(cd)  # [3c, TN]
    hidden = jax.nn.relu(mm(wr1T_ref[...], cat)).astype(cd)            # [Ca, TN]
    out = mm(wr2T_ref[...], hidden)                                    # [Ca, TN]
    # TODO(synk): nn.Dropout(drop_rate) is identity in eval mode; not applied.
    out_ref[0] = out.astype(out_ref.dtype)


# ----------------------------------------------------------------------------
# Glue: nn.Unfold(kernel=r, stride=r) equivalents (pure reshape/transpose).
# ----------------------------------------------------------------------------
def _unfold_cf(x, r):
    # NCHW [B, C, Ha*r, Wa*r] -> [B, r*r, C, Ha*Wa]  (channels-first, for kernel)
    B, C, Hb, Wb = x.shape
    Ha, Wa = Hb // r, Wb // r
    x = x.reshape(B, C, Ha, r, Wa, r)
    x = x.transpose(0, 3, 5, 1, 2, 4)            # [B, kh, kw, C, Ha, Wa]
    return x.reshape(B, r * r, C, Ha * Wa)


def _unfold_cl(x, r):
    # NCHW [B, C, Ha*r, Wa*r] -> [B, r*r, Ha*Wa, C]  (channels-last, reference)
    B, C, Hb, Wb = x.shape
    Ha, Wa = Hb // r, Wb // r
    x = x.reshape(B, C, Ha, r, Wa, r)
    x = x.transpose(0, 3, 5, 2, 4, 1)            # [B, kh, kw, Ha, Wa, C]
    return x.reshape(B, r * r, Ha * Wa, C)


def _pick_tile_n(N, max_tile):
    """Spatial tile: largest multiple of 128 <= max_tile dividing N, else N.

    A 128-multiple (or full-N) tile keeps every block's lane dimension
    unmasked / lane-dense (inputs and output stores).
    TODO(synk): ragged-tail handling (padding + pl.when mask) for awkward N.
    """
    if N <= max_tile:
        return N
    t = (max_tile // 128) * 128
    while t >= 128:
        if N % t == 0:
            return t
        t -= 128
    return N


def graph_reasoning_forward(vert_a, vert_b, vert_c, params, spatial_ratio,
                            compute_dtype=jnp.bfloat16, out_dtype=None,
                            max_tile_n=256):
    # max_tile_n=256 keeps the double-buffered blocks well inside scoped VMEM
    # on all generations (incl. v7x's 64 MiB physical) and gives the grid more
    # steps to feed v7x's two TensorCores; raise to 512 on v5e/v6e if N allows.
    r0, r1 = spatial_ratio
    B, Ca, Ha, Wa = vert_a.shape
    N = Ha * Wa
    K0, K1 = r0 * r0, r1 * r1

    (wa1, wa2, wgb, wgc, wb1, wb2, wc1, wc2, wab, wac, wr1, wr2) = params
    va_out = wa1.shape[1]
    vb_out = wb2.shape[1]
    vc_out = wc2.shape[1]
    # The elementwise gate multiply in the original forward implies this:
    assert va_out == vb_out == vc_out, "GraphReasoning requires va_out == vb_out == vc_out"
    assert wgb.shape[1] == va_out and wgc.shape[1] == va_out

    cd = compute_dtype
    od = out_dtype if out_dtype is not None else cd

    # Inputs: vert_a stays in its native NCHW layout (free reshape only).
    a_cf = vert_a.reshape(B, Ca, N).astype(cd)                           # [B, Ca, N]
    bp = _unfold_cf(vert_b, r0).astype(cd)                               # [B, K0, Cb, N]
    cp = _unfold_cf(vert_c, r1).astype(cd)                               # [B, K1, Cc, N]
    Cb, Cc = bp.shape[2], cp.shape[2]

    # Weight prep (f32, then cast): fuse the three 1x1 convs on vert_a; fold
    # the reweight vectors into the second embedding matmuls as extra rows.
    wab_a, wab_x = wab[0, :va_out], wab[0, va_out:]
    wac_a, wac_x = wac[0, :va_out], wac[0, va_out:]
    waT = jnp.concatenate([wa1, wgb, wgc], axis=1).T.astype(cd)          # [3*va, Ca]
    wa2T = jnp.concatenate([wa2,
                            (wa2 @ wab_a)[:, None],
                            (wa2 @ wac_a)[:, None]], axis=1).T.astype(cd)  # [va+2, va]
    wb2T = jnp.concatenate([wb2, (wb2 @ wab_x)[:, None]], axis=1).T.astype(cd)
    wc2T = jnp.concatenate([wc2, (wc2 @ wac_x)[:, None]], axis=1).T.astype(cd)
    weights = [waT, wa2T,
               wb1.T.astype(cd), wb2T,
               wc1.T.astype(cd), wc2T,
               wr1.T.astype(cd), wr2.T.astype(cd)]

    TN = _pick_tile_n(N, max_tile_n)
    NT = N // TN

    # Explicit scoped-VMEM budget: 2x double-buffered input/output blocks +
    # weights + channels-first intermediates (online softmax keeps those to a
    # few [c_out, TN] tensors).  Clamp to a range that is safe on v5e..v7x.
    isz = jnp.dtype(cd).itemsize
    blk = (Ca * TN + K0 * Cb * TN + K1 * Cc * TN) * isz \
        + Ca * TN * jnp.dtype(od).itemsize
    wbytes = sum(int(w.size) * isz for w in weights)
    interm = 12 * max(va_out, vb_out, vc_out) * TN * 4
    vmem_limit = int(min(max(2 * blk + 2 * wbytes + interm + (8 << 20),
                             32 << 20), 48 << 20))

    def full_spec(w):
        return pl.BlockSpec(w.shape, lambda b, n: (0, 0))

    kernel = functools.partial(
        _graph_reasoning_kernel,
        exact_recip=(jnp.dtype(cd) == jnp.dtype(jnp.float32)))

    out = pl.pallas_call(
        kernel,
        out_shape=jax.ShapeDtypeStruct((B, Ca, N), od),
        grid=(B, NT),
        in_specs=[
            pl.BlockSpec((1, Ca, TN), lambda b, n: (b, 0, n)),
            pl.BlockSpec((1, K0, Cb, TN), lambda b, n: (b, 0, 0, n)),
            pl.BlockSpec((1, K1, Cc, TN), lambda b, n: (b, 0, 0, n)),
        ] + [full_spec(w) for w in weights],
        out_specs=pl.BlockSpec((1, Ca, TN), lambda b, n: (b, 0, n)),
        compiler_params=pltpu.CompilerParams(
            dimension_semantics=("parallel", "parallel"),
            vmem_limit_bytes=vmem_limit),
    )(a_cf, bp, cp, *weights)

    # Output is already channels-first: straight reshape to NCHW, no transpose.
    return out.reshape(B, Ca, Ha, Wa)


# ----------------------------------------------------------------------------
# Pure-JAX f32 reference (same math as the PyTorch module) for verification.
# ----------------------------------------------------------------------------
def reference_forward(vert_a, vert_b, vert_c, params, spatial_ratio):
    r0, r1 = spatial_ratio
    B, Ca, Ha, Wa = vert_a.shape
    N = Ha * Wa
    a = vert_a.transpose(0, 2, 3, 1).reshape(B, N, Ca)
    bp = _unfold_cl(vert_b, r0)
    cp = _unfold_cl(vert_c, r1)
    (wa1, wa2, wgb, wgc, wb1, wb2, wc1, wc2, wab, wac, wr1, wr2) = params

    emb_a = jax.nn.relu(a @ wa1) @ wa2
    gate_b = 1.0 - jax.nn.sigmoid(a @ wgb)
    gate_c = 1.0 - jax.nn.sigmoid(a @ wgc)
    emb_b = jax.nn.relu(bp @ wb1) @ wb2
    emb_c = jax.nn.relu(cp @ wc1) @ wc2

    def agg(emb_x, w_re, gate):
        K = emb_x.shape[1]
        a_b = jnp.broadcast_to(emb_a[:, None], (B, K, N, emb_a.shape[-1]))
        cat = jnp.concatenate([a_b, emb_x], axis=-1)
        logits = jax.nn.relu(jnp.einsum('bknd,d->bkn', cat, w_re[0]))
        w = jax.nn.softmax(logits, axis=1)
        return jnp.einsum('bkn,bknc->bnc', w, emb_x) * gate

    agg_b = agg(emb_b, wab, gate_b)
    agg_c = agg(emb_c, wac, gate_c)
    s = jax.nn.sigmoid(jnp.concatenate([agg_b, agg_c, emb_a], axis=-1))
    out = jax.nn.relu(s @ wr1) @ wr2
    return out.reshape(B, Ha, Wa, Ca).transpose(0, 3, 1, 2)


if __name__ == "__main__":
    # Module config (synthetic, small): requires va_out == vb_out == vc_out
    # (implied by the elementwise gate multiply in the original forward).
    B = 2
    va_in, va_out = 16, 16
    vb_in, vb_out = 8, 16
    vc_in, vc_out = 8, 16
    spatial_ratio = (2, 4)
    Ha = Wa = 8

    key = jax.random.PRNGKey(0)
    ks = jax.random.split(key, 16)
    f32 = jnp.float32

    # Deterministic synthetic parameters (no bias anywhere, as in the module).
    wa1 = 0.2 * jax.random.normal(ks[0], (va_in, va_out), f32)
    wa2 = 0.2 * jax.random.normal(ks[1], (va_out, va_out), f32)
    wgb = 0.2 * jax.random.normal(ks[2], (va_in, va_out), f32)
    wgc = 0.2 * jax.random.normal(ks[3], (va_in, va_out), f32)
    wb1 = 0.2 * jax.random.normal(ks[4], (vb_in, vb_out), f32)
    wb2 = 0.2 * jax.random.normal(ks[5], (vb_out, vb_out), f32)
    wc1 = 0.2 * jax.random.normal(ks[6], (vc_in, vc_out), f32)
    wc2 = 0.2 * jax.random.normal(ks[7], (vc_out, vc_out), f32)
    wab = 0.2 * jax.random.normal(ks[8], (1, va_out + vb_out), f32)
    wac = 0.2 * jax.random.normal(ks[9], (1, va_out + vc_out), f32)
    wr1 = 0.2 * jax.random.normal(ks[10], (vb_out + vc_out + va_out, va_in), f32)
    wr2 = 0.2 * jax.random.normal(ks[11], (va_in, va_in), f32)
    params = (wa1, wa2, wgb, wgc, wb1, wb2, wc1, wc2, wab, wac, wr1, wr2)

    # Inputs (NCHW, like the PyTorch module expects).
    vert_a = jax.random.normal(ks[12], (B, va_in, Ha, Wa), f32)
    vert_b = jax.random.normal(ks[13], (B, vb_in, Ha * spatial_ratio[0],
                                        Wa * spatial_ratio[0]), f32)
    vert_c = jax.random.normal(ks[14], (B, vc_in, Ha * spatial_ratio[1],
                                        Wa * spatial_ratio[1]), f32)

    ref = jax.block_until_ready(
        reference_forward(vert_a, vert_b, vert_c, params, spatial_ratio))

    # Exact-math check (f32 end to end, exact reciprocal in the softmax).
    out_f32 = jax.block_until_ready(
        graph_reasoning_forward(vert_a, vert_b, vert_c, params, spatial_ratio,
                                compute_dtype=jnp.float32))
    assert out_f32.shape == (B, va_in, Ha, Wa), out_f32.shape
    if not jnp.allclose(out_f32, ref, atol=2e-2, rtol=2e-2):
        raise AssertionError("Pallas kernel (f32) mismatch vs JAX reference")

    # Fast path check (bf16 MXU inputs / stores, f32 accumulation + softmax).
    out_bf16 = jax.block_until_ready(
        graph_reasoning_forward(vert_a, vert_b, vert_c, params, spatial_ratio,
                                compute_dtype=jnp.bfloat16))
    assert out_bf16.shape == (B, va_in, Ha, Wa), out_bf16.shape
    if not jnp.allclose(out_bf16.astype(f32), ref, atol=5e-2, rtol=5e-2):
        raise AssertionError("Pallas kernel (bf16) mismatch vs JAX reference")

    print("KERNEL_OK")
</pallas_src>

<mosaic_0001>
module attributes {stable_mosaic.version = 11 : i64} {
  func.func @_graph_reasoning_kernel(%arg0: i32, %arg1: i32, %arg2: memref<1x16x64xf32, #tpu.memory_space<vmem>>, %arg3: memref<1x4x8x64xf32, #tpu.memory_space<vmem>>, %arg4: memref<1x16x8x64xf32, #tpu.memory_space<vmem>>, %arg5: memref<48x16xf32, #tpu.memory_space<vmem>>, %arg6: memref<18x16xf32, #tpu.memory_space<vmem>>, %arg7: memref<16x8xf32, #tpu.memory_space<vmem>>, %arg8: memref<17x16xf32, #tpu.memory_space<vmem>>, %arg9: memref<16x8xf32, #tpu.memory_space<vmem>>, %arg10: memref<17x16xf32, #tpu.memory_space<vmem>>, %arg11: memref<16x48xf32, #tpu.memory_space<vmem>>, %arg12: memref<16x16xf32, #tpu.memory_space<vmem>>, %arg13: memref<1x16x64xf32, #tpu.memory_space<vmem>>) attributes {dimension_semantics = [#tpu.dimension_semantics<parallel>, #tpu.dimension_semantics<parallel>], iteration_bounds = array<i64: 2, 1>, scalar_prefetch = 0 : i64, scratch_operands = 0 : i64, tpu.core_type = #tpu.core_type<tc>, window_params = [{transform_indices = @transform_0, window_bounds = array<i64: 1, 16, 64>}, {transform_indices = @transform_1, window_bounds = array<i64: 1, 4, 8, 64>}, {transform_indices = @transform_2, window_bounds = array<i64: 1, 16, 8, 64>}, {pipeline_mode = #tpu.pipeline_mode<synchronous>, transform_indices = @transform_3, window_bounds = array<i64: 48, 16>}, {pipeline_mode = #tpu.pipeline_mode<synchronous>, transform_indices = @transform_4, window_bounds = array<i64: 18, 16>}, {pipeline_mode = #tpu.pipeline_mode<synchronous>, transform_indices = @transform_5, window_bounds = array<i64: 16, 8>}, {pipeline_mode = #tpu.pipeline_mode<synchronous>, transform_indices = @transform_6, window_bounds = array<i64: 17, 16>}, {pipeline_mode = #tpu.pipeline_mode<synchronous>, transform_indices = @transform_7, window_bounds = array<i64: 16, 8>}, {pipeline_mode = #tpu.pipeline_mode<synchronous>, transform_indices = @transform_8, window_bounds = array<i64: 17, 16>}, {pipeline_mode = #tpu.pipeline_mode<synchronous>, transform_indices = @transform_9, window_bounds = array<i64: 16, 48>}, {pipeline_mode = #tpu.pipeline_mode<synchronous>, transform_indices = @transform_10, window_bounds = array<i64: 16, 16>}, {transform_indices = @transform_11, window_bounds = array<i64: 1, 16, 64>}]} {
    %c0 = arith.constant 0 : index
    %c0_0 = arith.constant 0 : index
    %c0_1 = arith.constant 0 : index
    %0 = vector.load %arg2[%c0, %c0_0, %c0_1] : memref<1x16x64xf32, #tpu.memory_space<vmem>>, vector<1x16x64xf32>
    %1 = vector.shape_cast %0 : vector<1x16x64xf32> to vector<16x64xf32>
    %c0_2 = arith.constant 0 : index
    %c0_3 = arith.constant 0 : index
    %2 = vector.load %arg5[%c0_2, %c0_3] : memref<48x16xf32, #tpu.memory_space<vmem>>, vector<48x16xf32>
    %cst = arith.constant dense<0.000000e+00> : vector<48x64xf32>
    %3 = tpu.matmul %2, %1, %cst {dimension_numbers = #tpu.dot_dimension_numbers<[1], [0], [0], [1], [0, 0, 1, 1], [], []>} : vector<48x16xf32>, vector<16x64xf32>, vector<48x64xf32> -> vector<48x64xf32>
    %4 = vector.extract_strided_slice %3 {offsets = [16, 0], sizes = [16, 64], strides = [1, 1]} : vector<48x64xf32> to vector<16x64xf32>
    %5 = arith.negf %4 : vector<16x64xf32>
    %6 = math.exp %5 : vector<16x64xf32>
    %cst_4 = arith.constant 1.000000e+00 : f32
    %7 = vector.broadcast %cst_4 : f32 to vector<16x64xf32>
    %8 = arith.addf %7, %6 : vector<16x64xf32>
    %9 = arith.divf %7, %8 : vector<16x64xf32>
    %cst_5 = arith.constant 1.000000e+00 : f32
    %10 = vector.broadcast %cst_5 : f32 to vector<16x64xf32>
    %11 = arith.subf %10, %9 : vector<16x64xf32>
    %12 = vector.extract_strided_slice %3 {offsets = [32, 0], sizes = [16, 64], strides = [1, 1]} : vector<48x64xf32> to vector<16x64xf32>
    %13 = arith.negf %12 : vector<16x64xf32>
    %14 = math.exp %13 : vector<16x64xf32>
    %cst_6 = arith.constant 1.000000e+00 : f32
    %15 = vector.broadcast %cst_6 : f32 to vector<16x64xf32>
    %16 = arith.addf %15, %14 : vector<16x64xf32>
    %17 = arith.divf %15, %16 : vector<16x64xf32>
    %cst_7 = arith.constant 1.000000e+00 : f32
    %18 = vector.broadcast %cst_7 : f32 to vector<16x64xf32>
    %19 = arith.subf %18, %17 : vector<16x64xf32>
    %c0_8 = arith.constant 0 : index
    %c0_9 = arith.constant 0 : index
    %20 = vector.load %arg6[%c0_8, %c0_9] : memref<18x16xf32, #tpu.memory_space<vmem>>, vector<18x16xf32>
    %21 = vector.extract_strided_slice %3 {offsets = [0, 0], sizes = [16, 64], strides = [1, 1]} : vector<48x64xf32> to vector<16x64xf32>
    %cst_10 = arith.constant 0.000000e+00 : f32
    %22 = vector.broadcast %cst_10 : f32 to vector<16x64xf32>
    %23 = arith.maximumf %21, %22 : vector<16x64xf32>
    %cst_11 = arith.constant dense<0.000000e+00> : vector<18x64xf32>
    %24 = tpu.matmul %20, %23, %cst_11 {dimension_numbers = #tpu.dot_dimension_numbers<[1], [0], [0], [1], [0, 0, 1, 1], [], []>} : vector<18x16xf32>, vector<16x64xf32>, vector<18x64xf32> -> vector<18x64xf32>
    %25 = vector.extract_strided_slice %24 {offsets = [0, 0], sizes = [16, 64], strides = [1, 1]} : vector<18x64xf32> to vector<16x64xf32>
    %26 = vector.extract_strided_slice %24 {offsets = [16, 0], sizes = [1, 64], strides = [1, 1]} : vector<18x64xf32> to vector<1x64xf32>
    %27 = vector.extract_strided_slice %24 {offsets = [17, 0], sizes = [1, 64], strides = [1, 1]} : vector<18x64xf32> to vector<1x64xf32>
    %c0_12 = arith.constant 0 : index
    %c0_13 = arith.constant 0 : index
    %28 = vector.load %arg7[%c0_12, %c0_13] : memref<16x8xf32, #tpu.memory_space<vmem>>, vector<16x8xf32>
    %c0_14 = arith.constant 0 : index
    %c0_15 = arith.constant 0 : index
    %29 = vector.load %arg8[%c0_14, %c0_15] : memref<17x16xf32, #tpu.memory_space<vmem>>, vector<17x16xf32>
    %cst_16 = arith.constant 0.000000e+00 : f32
    %30 = vector.broadcast %cst_16 : f32 to vector<1x64xf32>
    %cst_17 = arith.constant 0.000000e+00 : f32
    %31 = vector.broadcast %cst_17 : f32 to vector<1x64xf32>
    %cst_18 = arith.constant 0.000000e+00 : f32
    %32 = vector.broadcast %cst_18 : f32 to vector<16x64xf32>
    %c0_19 = arith.constant 0 : index
    %c0_20 = arith.constant 0 : index
    %c0_21 = arith.constant 0 : index
    %c0_22 = arith.constant 0 : index
    %33 = vector.load %arg3[%c0_19, %c0_20, %c0_21, %c0_22] : memref<1x4x8x64xf32, #tpu.memory_space<vmem>>, vector<1x1x8x64xf32>
    %34 = vector.shape_cast %33 : vector<1x1x8x64xf32> to vector<8x64xf32>
    %cst_23 = arith.constant dense<0.000000e+00> : vector<16x64xf32>
    %35 = tpu.matmul %28, %34, %cst_23 {dimension_numbers = #tpu.dot_dimension_numbers<[1], [0], [0], [1], [0, 0, 1, 1], [], []>} : vector<16x8xf32>, vector<8x64xf32>, vector<16x64xf32> -> vector<16x64xf32>
    %cst_24 = arith.constant 0.000000e+00 : f32
    %36 = vector.broadcast %cst_24 : f32 to vector<16x64xf32>
    %37 = arith.maximumf %35, %36 : vector<16x64xf32>
    %cst_25 = arith.constant dense<0.000000e+00> : vector<17x64xf32>
    %38 = tpu.matmul %29, %37, %cst_25 {dimension_numbers = #tpu.dot_dimension_numbers<[1], [0], [0], [1], [0, 0, 1, 1], [], []>} : vector<17x16xf32>, vector<16x64xf32>, vector<17x64xf32> -> vector<17x64xf32>
    %39 = vector.extract_strided_slice %38 {offsets = [16, 0], sizes = [1, 64], strides = [1, 1]} : vector<17x64xf32> to vector<1x64xf32>
    %40 = arith.addf %39, %26 : vector<1x64xf32>
    %cst_26 = arith.constant 0.000000e+00 : f32
    %41 = vector.broadcast %cst_26 : f32 to vector<1x64xf32>
    %42 = arith.maximumf %40, %41 : vector<1x64xf32>
    %43 = arith.maximumf %30, %42 : vector<1x64xf32>
    %44 = arith.subf %30, %43 : vector<1x64xf32>
    %45 = math.exp %44 : vector<1x64xf32>
    %46 = arith.subf %42, %43 : vector<1x64xf32>
    %47 = math.exp %46 : vector<1x64xf32>
    %48 = arith.mulf %31, %45 : vector<1x64xf32>
    %49 = arith.addf %48, %47 : vector<1x64xf32>
    %50 = vector.broadcast %45 : vector<1x64xf32> to vector<16x64xf32>
    %51 = arith.mulf %32, %50 : vector<16x64xf32>
    %52 = vector.extract_strided_slice %38 {offsets = [0, 0], sizes = [16, 64], strides = [1, 1]} : vector<17x64xf32> to vector<16x64xf32>
    %53 = vector.broadcast %47 : vector<1x64xf32> to vector<16x64xf32>
    %54 = arith.mulf %52, %53 : vector<16x64xf32>
    %55 = arith.addf %51, %54 : vector<16x64xf32>
    %c0_27 = arith.constant 0 : index
    %c1 = arith.constant 1 : index
    %c0_28 = arith.constant 0 : index
    %c0_29 = arith.constant 0 : index
    %56 = vector.load %arg3[%c0_27, %c1, %c0_28, %c0_29] : memref<1x4x8x64xf32, #tpu.memory_space<vmem>>, vector<1x1x8x64xf32>
    %57 = vector.shape_cast %56 : vector<1x1x8x64xf32> to vector<8x64xf32>
    %cst_30 = arith.constant dense<0.000000e+00> : vector<16x64xf32>
    %58 = tpu.matmul %28, %57, %cst_30 {dimension_numbers = #tpu.dot_dimension_numbers<[1], [0], [0], [1], [0, 0, 1, 1], [], []>} : vector<16x8xf32>, vector<8x64xf32>, vector<16x64xf32> -> vector<16x64xf32>
    %cst_31 = arith.constant 0.000000e+00 : f32
    %59 = vector.broadcast %cst_31 : f32 to vector<16x64xf32>
    %60 = arith.maximumf %58, %59 : vector<16x64xf32>
    %cst_32 = arith.constant dense<0.000000e+00> : vector<17x64xf32>
    %61 = tpu.matmul %29, %60, %cst_32 {dimension_numbers = #tpu.dot_dimension_numbers<[1], [0], [0], [1], [0, 0, 1, 1], [], []>} : vector<17x16xf32>, vector<16x64xf32>, vector<17x64xf32> -> vector<17x64xf32>
    %62 = vector.extract_strided_slice %61 {offsets = [16, 0], sizes = [1, 64], strides = [1, 1]} : vector<17x64xf32> to vector<1x64xf32>
    %63 = arith.addf %62, %26 : vector<1x64xf32>
    %cst_33 = arith.constant 0.000000e+00 : f32
    %64 = vector.broadcast %cst_33 : f32 to vector<1x64xf32>
    %65 = arith.maximumf %63, %64 : vector<1x64xf32>
    %66 = arith.maximumf %43, %65 : vector<1x64xf32>
    %67 = arith.subf %43, %66 : vector<1x64xf32>
    %68 = math.exp %67 : vector<1x64xf32>
    %69 = arith.subf %65, %66 : vector<1x64xf32>
    %70 = math.exp %69 : vector<1x64xf32>
    %71 = arith.mulf %49, %68 : vector<1x64xf32>
    %72 = arith.addf %71, %70 : vector<1x64xf32>
    %73 = vector.broadcast %68 : vector<1x64xf32> to vector<16x64xf32>
    %74 = arith.mulf %55, %73 : vector<16x64xf32>
    %75 = vector.extract_strided_slice %61 {offsets = [0, 0], sizes = [16, 64], strides = [1, 1]} : vector<17x64xf32> to vector<16x64xf32>
    %76 = vector.broadcast %70 : vector<1x64xf32> to vector<16x64xf32>
    %77 = arith.mulf %75, %76 : vector<16x64xf32>
    %78 = arith.addf %74, %77 : vector<16x64xf32>
    %c0_34 = arith.constant 0 : index
    %c2 = arith.constant 2 : index
    %c0_35 = arith.constant 0 : index
    %c0_36 = arith.constant 0 : index
    %79 = vector.load %arg3[%c0_34, %c2, %c0_35, %c0_36] : memref<1x4x8x64xf32, #tpu.memory_space<vmem>>, vector<1x1x8x64xf32>
    %80 = vector.shape_cast %79 : vector<1x1x8x64xf32> to vector<8x64xf32>
    %cst_37 = arith.constant dense<0.000000e+00> : vector<16x64xf32>
    %81 = tpu.matmul %28, %80, %cst_37 {dimension_numbers = #tpu.dot_dimension_numbers<[1], [0], [0], [1], [0, 0, 1, 1], [], []>} : vector<16x8xf32>, vector<8x64xf32>, vector<16x64xf32> -> vector<16x64xf32>
    %cst_38 = arith.constant 0.000000e+00 : f32
    %82 = vector.broadcast %cst_38 : f32 to vector<16x64xf32>
    %83 = arith.maximumf %81, %82 : vector<16x64xf32>
    %cst_39 = arith.constant dense<0.000000e+00> : vector<17x64xf32>
    %84 = tpu.matmul %29, %83, %cst_39 {dimension_numbers = #tpu.dot_dimension_numbers<[1], [0], [0], [1], [0, 0, 1, 1], [], []>} : vector<17x16xf32>, vector<16x64xf32>, vector<17x64xf32> -> vector<17x64xf32>
    %85 = vector.extract_strided_slice %84 {offsets = [16, 0], sizes = [1, 64], strides = [1, 1]} : vector<17x64xf32> to vector<1x64xf32>
    %86 = arith.addf %85, %26 : vector<1x64xf32>
    %cst_40 = arith.constant 0.000000e+00 : f32
    %87 = vector.broadcast %cst_40 : f32 to vector<1x64xf32>
    %88 = arith.maximumf %86, %87 : vector<1x64xf32>
    %89 = arith.maximumf %66, %88 : vector<1x64xf32>
    %90 = arith.subf %66, %89 : vector<1x64xf32>
    %91 = math.exp %90 : vector<1x64xf32>
    %92 = arith.subf %88, %89 : vector<1x64xf32>
    %93 = math.exp %92 : vector<1x64xf32>
    %94 = arith.mulf %72, %91 : vector<1x64xf32>
    %95 = arith.addf %94, %93 : vector<1x64xf32>
    %96 = vector.broadcast %91 : vector<1x64xf32> to vector<16x64xf32>
    %97 = arith.mulf %78, %96 : vector<16x64xf32>
    %98 = vector.extract_strided_slice %84 {offsets = [0, 0], sizes = [16, 64], strides = [1, 1]} : vector<17x64xf32> to vector<16x64xf32>
    %99 = vector.broadcast %93 : vector<1x64xf32> to vector<16x64xf32>
    %100 = arith.mulf %98, %99 : vector<16x64xf32>
    %101 = arith.addf %97, %100 : vector<16x64xf32>
    %c0_41 = arith.constant 0 : index
    %c3 = arith.constant 3 : index
    %c0_42 = arith.constant 0 : index
    %c0_43 = arith.constant 0 : index
    %102 = vector.load %arg3[%c0_41, %c3, %c0_42, %c0_43] : memref<1x4x8x64xf32, #tpu.memory_space<vmem>>, vector<1x1x8x64xf32>
    %103 = vector.shape_cast %102 : vector<1x1x8x64xf32> to vector<8x64xf32>
    %cst_44 = arith.constant dense<0.000000e+00> : vector<16x64xf32>
    %104 = tpu.matmul %28, %103, %cst_44 {dimension_numbers = #tpu.dot_dimension_numbers<[1], [0], [0], [1], [0, 0, 1, 1], [], []>} : vector<16x8xf32>, vector<8x64xf32>, vector<16x64xf32> -> vector<16x64xf32>
    %cst_45 = arith.constant 0.000000e+00 : f32
    %105 = vector.broadcast %cst_45 : f32 to vector<16x64xf32>
    %106 = arith.maximumf %104, %105 : vector<16x64xf32>
    %cst_46 = arith.constant dense<0.000000e+00> : vector<17x64xf32>
    %107 = tpu.matmul %29, %106, %cst_46 {dimension_numbers = #tpu.dot_dimension_numbers<[1], [0], [0], [1], [0, 0, 1, 1], [], []>} : vector<17x16xf32>, vector<16x64xf32>, vector<17x64xf32> -> vector<17x64xf32>
    %108 = vector.extract_strided_slice %107 {offsets = [16, 0], sizes = [1, 64], strides = [1, 1]} : vector<17x64xf32> to vector<1x64xf32>
    %109 = arith.addf %108, %26 : vector<1x64xf32>
    %cst_47 = arith.constant 0.000000e+00 : f32
    %110 = vector.broadcast %cst_47 : f32 to vector<1x64xf32>
    %111 = arith.maximumf %109, %110 : vector<1x64xf32>
    %112 = arith.maximumf %89, %111 : vector<1x64xf32>
    %113 = arith.subf %89, %112 : vector<1x64xf32>
    %114 = math.exp %113 : vector<1x64xf32>
    %115 = arith.subf %111, %112 : vector<1x64xf32>
    %116 = math.exp %115 : vector<1x64xf32>
    %117 = arith.mulf %95, %114 : vector<1x64xf32>
    %118 = arith.addf %117, %116 : vector<1x64xf32>
    %119 = vector.broadcast %114 : vector<1x64xf32> to vector<16x64xf32>
    %120 = arith.mulf %101, %119 : vector<16x64xf32>
    %121 = vector.extract_strided_slice %107 {offsets = [0, 0], sizes = [16, 64], strides = [1, 1]} : vector<17x64xf32> to vector<16x64xf32>
    %122 = vector.broadcast %116 : vector<1x64xf32> to vector<16x64xf32>
    %123 = arith.mulf %121, %122 : vector<16x64xf32>
    %124 = arith.addf %120, %123 : vector<16x64xf32>
    %cst_48 = arith.constant 1.000000e+00 : f32
    %125 = vector.broadcast %cst_48 : f32 to vector<1x64xf32>
    %126 = arith.divf %125, %118 : vector<1x64xf32>
    %127 = vector.broadcast %126 : vector<1x64xf32> to vector<16x64xf32>
    %128 = arith.mulf %124, %127 : vector<16x64xf32>
    %129 = arith.mulf %128, %11 : vector<16x64xf32>
    %c0_49 = arith.constant 0 : index
    %c0_50 = arith.constant 0 : index
    %130 = vector.load %arg9[%c0_49, %c0_50] : memref<16x8xf32, #tpu.memory_space<vmem>>, vector<16x8xf32>
    %c0_51 = arith.constant 0 : index
    %c0_52 = arith.constant 0 : index
    %131 = vector.load %arg10[%c0_51, %c0_52] : memref<17x16xf32, #tpu.memory_space<vmem>>, vector<17x16xf32>
    %cst_53 = arith.constant 0.000000e+00 : f32
    %132 = vector.broadcast %cst_53 : f32 to vector<1x64xf32>
    %cst_54 = arith.constant 0.000000e+00 : f32
    %133 = vector.broadcast %cst_54 : f32 to vector<1x64xf32>
    %cst_55 = arith.constant 0.000000e+00 : f32
    %134 = vector.broadcast %cst_55 : f32 to vector<16x64xf32>
    %c0_56 = arith.constant 0 : index
    %c0_57 = arith.constant 0 : index
    %c0_58 = arith.constant 0 : index
    %c0_59 = arith.constant 0 : index
    %135 = vector.load %arg4[%c0_56, %c0_57, %c0_58, %c0_59] : memref<1x16x8x64xf32, #tpu.memory_space<vmem>>, vector<1x1x8x64xf32>
    %136 = vector.shape_cast %135 : vector<1x1x8x64xf32> to vector<8x64xf32>
    %cst_60 = arith.constant dense<0.000000e+00> : vector<16x64xf32>
    %137 = tpu.matmul %130, %136, %cst_60 {dimension_numbers = #tpu.dot_dimension_numbers<[1], [0], [0], [1], [0, 0, 1, 1], [], []>} : vector<16x8xf32>, vector<8x64xf32>, vector<16x64xf32> -> vector<16x64xf32>
    %cst_61 = arith.constant 0.000000e+00 : f32
    %138 = vector.broadcast %cst_61 : f32 to vector<16x64xf32>
    %139 = arith.maximumf %137, %138 : vector<16x64xf32>
    %cst_62 = arith.constant dense<0.000000e+00> : vector<17x64xf32>
    %140 = tpu.matmul %131, %139, %cst_62 {dimension_numbers = #tpu.dot_dimension_numbers<[1], [0], [0], [1], [0, 0, 1, 1], [], []>} : vector<17x16xf32>, vector<16x64xf32>, vector<17x64xf32> -> vector<17x64xf32>
    %141 = vector.extract_strided_slice %140 {offsets = [16, 0], sizes = [1, 64], strides = [1, 1]} : vector<17x64xf32> to vector<1x64xf32>
    %142 = arith.addf %141, %27 : vector<1x64xf32>
    %cst_63 = arith.constant 0.000000e+00 : f32
    %143 = vector.broadcast %cst_63 : f32 to vector<1x64xf32>
    %144 = arith.maximumf %142, %143 : vector<1x64xf32>
    %145 = arith.maximumf %132, %144 : vector<1x64xf32>
    %146 = arith.subf %132, %145 : vector<1x64xf32>
    %147 = math.exp %146 : vector<1x64xf32>
    %148 = arith.subf %144, %145 : vector<1x64xf32>
    %149 = math.exp %148 : vector<1x64xf32>
    %150 = arith.mulf %133, %147 : vector<1x64xf32>
    %151 = arith.addf %150, %149 : vector<1x64xf32>
    %152 = vector.broadcast %147 : vector<1x64xf32> to vector<16x64xf32>
    %153 = arith.mulf %134, %152 : vector<16x64xf32>
    %154 = vector.extract_strided_slice %140 {offsets = [0, 0], sizes = [16, 64], strides = [1, 1]} : vector<17x64xf32> to vector<16x64xf32>
    %155 = vector.broadcast %149 : vector<1x64xf32> to vector<16x64xf32>
    %156 = arith.mulf %154, %155 : vector<16x64xf32>
    %157 = arith.addf %153, %156 : vector<16x64xf32>
    %c0_64 = arith.constant 0 : index
    %c1_65 = arith.constant 1 : index
    %c0_66 = arith.constant 0 : index
    %c0_67 = arith.constant 0 : index
    %158 = vector.load %arg4[%c0_64, %c1_65, %c0_66, %c0_67] : memref<1x16x8x64xf32, #tpu.memory_space<vmem>>, vector<1x1x8x64xf32>
    %159 = vector.shape_cast %158 : vector<1x1x8x64xf32> to vector<8x64xf32>
    %cst_68 = arith.constant dense<0.000000e+00> : vector<16x64xf32>
    %160 = tpu.matmul %130, %159, %cst_68 {dimension_numbers = #tpu.dot_dimension_numbers<[1], [0], [0], [1], [0, 0, 1, 1], [], []>} : vector<16x8xf32>, vector<8x64xf32>, vector<16x64xf32> -> vector<16x64xf32>
    %cst_69 = arith.constant 0.000000e+00 : f32
    %161 = vector.broadcast %cst_69 : f32 to vector<16x64xf32>
    %162 = arith.maximumf %160, %161 : vector<16x64xf32>
    %cst_70 = arith.constant dense<0.000000e+00> : vector<17x64xf32>
    %163 = tpu.matmul %131, %162, %cst_70 {dimension_numbers = #tpu.dot_dimension_numbers<[1], [0], [0], [1], [0, 0, 1, 1], [], []>} : vector<17x16xf32>, vector<16x64xf32>, vector<17x64xf32> -> vector<17x64xf32>
    %164 = vector.extract_strided_slice %163 {offsets = [16, 0], sizes = [1, 64], strides = [1, 1]} : vector<17x64xf32> to vector<1x64xf32>
    %165 = arith.addf %164, %27 : vector<1x64xf32>
    %cst_71 = arith.constant 0.000000e+00 : f32
    %166 = vector.broadcast %cst_71 : f32 to vector<1x64xf32>
    %167 = arith.maximumf %165, %166 : vector<1x64xf32>
    %168 = arith.maximumf %145, %167 : vector<1x64xf32>
    %169 = arith.subf %145, %168 : vector<1x64xf32>
    %170 = math.exp %169 : vector<1x64xf32>
    %171 = arith.subf %167, %168 : vector<1x64xf32>
    %172 = math.exp %171 : vector<1x64xf32>
    %173 = arith.mulf %151, %170 : vector<1x64xf32>
    %174 = arith.addf %173, %172 : vector<1x64xf32>
    %175 = vector.broadcast %170 : vector<1x64xf32> to vector<16x64xf32>
    %176 = arith.mulf %157, %175 : vector<16x64xf32>
    %177 = vector.extract_strided_slice %163 {offsets = [0, 0], sizes = [16, 64], strides = [1, 1]} : vector<17x64xf32> to vector<16x64xf32>
    %178 = vector.broadcast %172 : vector<1x64xf32> to vector<16x64xf32>
    %179 = arith.mulf %177, %178 : vector<16x64xf32>
    %180 = arith.addf %176, %179 : vector<16x64xf32>
    %c0_72 = arith.constant 0 : index
    %c2_73 = arith.constant 2 : index
    %c0_74 = arith.constant 0 : index
    %c0_75 = arith.constant 0 : index
    %181 = vector.load %arg4[%c0_72, %c2_73, %c0_74, %c0_75] : memref<1x16x8x64xf32, #tpu.memory_space<vmem>>, vector<1x1x8x64xf32>
    %182 = vector.shape_cast %181 : vector<1x1x8x64xf32> to vector<8x64xf32>
    %cst_76 = arith.constant dense<0.000000e+00> : vector<16x64xf32>
    %183 = tpu.matmul %130, %182, %cst_76 {dimension_numbers = #tpu.dot_dimension_numbers<[1], [0], [0], [1], [0, 0, 1, 1], [], []>} : vector<16x8xf32>, vector<8x64xf32>, vector<16x64xf32> -> vector<16x64xf32>
    %cst_77 = arith.constant 0.000000e+00 : f32
    %184 = vector.broadcast %cst_77 : f32 to vector<16x64xf32>
    %185 = arith.maximumf %183, %184 : vector<16x64xf32>
    %cst_78 = arith.constant dense<0.000000e+00> : vector<17x64xf32>
    %186 = tpu.matmul %131, %185, %cst_78 {dimension_numbers = #tpu.dot_dimension_numbers<[1], [0], [0], [1], [0, 0, 1, 1], [], []>} : vector<17x16xf32>, vector<16x64xf32>, vector<17x64xf32> -> vector<17x64xf32>
    %187 = vector.extract_strided_slice %186 {offsets = [16, 0], sizes = [1, 64], strides = [1, 1]} : vector<17x64xf32> to vector<1x64xf32>
    %188 = arith.addf %187, %27 : vector<1x64xf32>
    %cst_79 = arith.constant 0.000000e+00 : f32
    %189 = vector.broadcast %cst_79 : f32 to vector<1x64xf32>
    %190 = arith.maximumf %188, %189 : vector<1x64xf32>
    %191 = arith.maximumf %168, %190 : vector<1x64xf32>
    %192 = arith.subf %168, %191 : vector<1x64xf32>
    %193 = math.exp %192 : vector<1x64xf32>
    %194 = arith.subf %190, %191 : vector<1x64xf32>
    %195 = math.exp %194 : vector<1x64xf32>
    %196 = arith.mulf %174, %193 : vector<1x64xf32>
    %197 = arith.addf %196, %195 : vector<1x64xf32>
    %198 = vector.broadcast %193 : vector<1x64xf32> to vector<16x64xf32>
    %199 = arith.mulf %180, %198 : vector<16x64xf32>
    %200 = vector.extract_strided_slice %186 {offsets = [0, 0], sizes = [16, 64], strides = [1, 1]} : vector<17x64xf32> to vector<16x64xf32>
    %201 = vector.broadcast %195 : vector<1x64xf32> to vector<16x64xf32>
    %202 = arith.mulf %200, %201 : vector<16x64xf32>
    %203 = arith.addf %199, %202 : vector<16x64xf32>
    %c0_80 = arith.constant 0 : index
    %c3_81 = arith.constant 3 : index
    %c0_82 = arith.constant 0 : index
    %c0_83 = arith.constant 0 : index
    %204 = vector.load %arg4[%c0_80, %c3_81, %c0_82, %c0_83] : memref<1x16x8x64xf32, #tpu.memory_space<vmem>>, vector<1x1x8x64xf32>
    %205 = vector.shape_cast %204 : vector<1x1x8x64xf32> to vector<8x64xf32>
    %cst_84 = arith.constant dense<0.000000e+00> : vector<16x64xf32>
    %206 = tpu.matmul %130, %205, %cst_84 {dimension_numbers = #tpu.dot_dimension_numbers<[1], [0], [0], [1], [0, 0, 1, 1], [], []>} : vector<16x8xf32>, vector<8x64xf32>, vector<16x64xf32> -> vector<16x64xf32>
    %cst_85 = arith.constant 0.000000e+00 : f32
    %207 = vector.broadcast %cst_85 : f32 to vector<16x64xf32>
    %208 = arith.maximumf %206, %207 : vector<16x64xf32>
    %cst_86 = arith.constant dense<0.000000e+00> : vector<17x64xf32>
    %209 = tpu.matmul %131, %208, %cst_86 {dimension_numbers = #tpu.dot_dimension_numbers<[1], [0], [0], [1], [0, 0, 1, 1], [], []>} : vector<17x16xf32>, vector<16x64xf32>, vector<17x64xf32> -> vector<17x64xf32>
    %210 = vector.extract_strided_slice %209 {offsets = [16, 0], sizes = [1, 64], strides = [1, 1]} : vector<17x64xf32> to vector<1x64xf32>
    %211 = arith.addf %210, %27 : vector<1x64xf32>
    %cst_87 = arith.constant 0.000000e+00 : f32
    %212 = vector.broadcast %cst_87 : f32 to vector<1x64xf32>
    %213 = arith.maximumf %211, %212 : vector<1x64xf32>
    %214 = arith.maximumf %191, %213 : vector<1x64xf32>
    %215 = arith.subf %191, %214 : vector<1x64xf32>
    %216 = math.exp %215 : vector<1x64xf32>
    %217 = arith.subf %213, %214 : vector<1x64xf32>
    %218 = math.exp %217 : vector<1x64xf32>
    %219 = arith.mulf %197, %216 : vector<1x64xf32>
    %220 = arith.addf %219, %218 : vector<1x64xf32>
    %221 = vector.broadcast %216 : vector<1x64xf32> to vector<16x64xf32>
    %222 = arith.mulf %203, %221 : vector<16x64xf32>
    %223 = vector.extract_strided_slice %209 {offsets = [0, 0], sizes = [16, 64], strides = [1, 1]} : vector<17x64xf32> to vector<16x64xf32>
    %224 = vector.broadcast %218 : vector<1x64xf32> to vector<16x64xf32>
    %225 = arith.mulf %223, %224 : vector<16x64xf32>
    %226 = arith.addf %222, %225 : vector<16x64xf32>
    %c0_88 = arith.constant 0 : index
    %c4 = arith.constant 4 : index
    %c0_89 = arith.constant 0 : index
    %c0_90 = arith.constant 0 : index
    %227 = vector.load %arg4[%c0_88, %c4, %c0_89, %c0_90] : memref<1x16x8x64xf32, #tpu.memory_space<vmem>>, vector<1x1x8x64xf32>
    %228 = vector.shape_cast %227 : vector<1x1x8x64xf32> to vector<8x64xf32>
    %cst_91 = arith.constant dense<0.000000e+00> : vector<16x64xf32>
    %229 = tpu.matmul %130, %228, %cst_91 {dimension_numbers = #tpu.dot_dimension_numbers<[1], [0], [0], [1], [0, 0, 1, 1], [], []>} : vector<16x8xf32>, vector<8x64xf32>, vector<16x64xf32> -> vector<16x64xf32>
    %cst_92 = arith.constant 0.000000e+00 : f32
    %230 = vector.broadcast %cst_92 : f32 to vector<16x64xf32>
    %231 = arith.maximumf %229, %230 : vector<16x64xf32>
    %cst_93 = arith.constant dense<0.000000e+00> : vector<17x64xf32>
    %232 = tpu.matmul %131, %231, %cst_93 {dimension_numbers = #tpu.dot_dimension_numbers<[1], [0], [0], [1], [0, 0, 1, 1], [], []>} : vector<17x16xf32>, vector<16x64xf32>, vector<17x64xf32> -> vector<17x64xf32>
    %233 = vector.extract_strided_slice %232 {offsets = [16, 0], sizes = [1, 64], strides = [1, 1]} : vector<17x64xf32> to vector<1x64xf32>
    %234 = arith.addf %233, %27 : vector<1x64xf32>
    %cst_94 = arith.constant 0.000000e+00 : f32
    %235 = vector.broadcast %cst_94 : f32 to vector<1x64xf32>
    %236 = arith.maximumf %234, %235 : vector<1x64xf32>
    %237 = arith.maximumf %214, %236 : vector<1x64xf32>
    %238 = arith.subf %214, %237 : vector<1x64xf32>
    %239 = math.exp %238 : vector<1x64xf32>
    %240 = arith.subf %236, %237 : vector<1x64xf32>
    %241 = math.exp %240 : vector<1x64xf32>
    %242 = arith.mulf %220, %239 : vector<1x64xf32>
    %243 = arith.addf %242, %241 : vector<1x64xf32>
    %244 = vector.broadcast %239 : vector<1x64xf32> to vector<16x64xf32>
    %245 = arith.mulf %226, %244 : vector<16x64xf32>
    %246 = vector.extract_strided_slice %232 {offsets = [0, 0], sizes = [16, 64], strides = [1, 1]} : vector<17x64xf32> to vector<16x64xf32>
    %247 = vector.broadcast %241 : vector<1x64xf32> to vector<16x64xf32>
    %248 = arith.mulf %246, %247 : vector<16x64xf32>
    %249 = arith.addf %245, %248 : vector<16x64xf32>
    %c0_95 = arith.constant 0 : index
    %c5 = arith.constant 5 : index
    %c0_96 = arith.constant 0 : index
    %c0_97 = arith.constant 0 : index
    %250 = vector.load %arg4[%c0_95, %c5, %c0_96, %c0_97] : memref<1x16x8x64xf32, #tpu.memory_space<vmem>>, vector<1x1x8x64xf32>
    %251 = vector.shape_cast %250 : vector<1x1x8x64xf32> to vector<8x64xf32>
    %cst_98 = arith.constant dense<0.000000e+00> : vector<16x64xf32>
    %252 = tpu.matmul %130, %251, %cst_98 {dimension_numbers = #tpu.dot_dimension_numbers<[1], [0], [0], [1], [0, 0, 1, 1], [], []>} : vector<16x8xf32>, vector<8x64xf32>, vector<16x64xf32> -> vector<16x64xf32>
    %cst_99 = arith.constant 0.000000e+00 : f32
    %253 = vector.broadcast %cst_99 : f32 to vector<16x64xf32>
    %254 = arith.maximumf %252, %253 : vector<16x64xf32>
    %cst_100 = arith.constant dense<0.000000e+00> : vector<17x64xf32>
    %255 = tpu.matmul %131, %254, %cst_100 {dimension_numbers = #tpu.dot_dimension_numbers<[1], [0], [0], [1], [0, 0, 1, 1], [], []>} : vector<17x16xf32>, vector<16x64xf32>, vector<17x64xf32> -> vector<17x64xf32>
    %256 = vector.extract_strided_slice %255 {offsets = [16, 0], sizes = [1, 64], strides = [1, 1]} : vector<17x64xf32> to vector<1x64xf32>
    %257 = arith.addf %256, %27 : vector<1x64xf32>
    %cst_101 = arith.constant 0.000000e+00 : f32
    %258 = vector.broadcast %cst_101 : f32 to vector<1x64xf32>
    %259 = arith.maximumf %257, %258 : vector<1x64xf32>
    %260 = arith.maximumf %237, %259 : vector<1x64xf32>
    %261 = arith.subf %237, %260 : vector<1x64xf32>
    %262 = math.exp %261 : vector<1x64xf32>
    %263 = arith.subf %259, %260 : vector<1x64xf32>
    %264 = math.exp %263 : vector<1x64xf32>
    %265 = arith.mulf %243, %262 : vector<1x64xf32>
    %266 = arith.addf %265, %264 : vector<1x64xf32>
    %267 = vector.broadcast %262 : vector<1x64xf32> to vector<16x64xf32>
    %268 = arith.mulf %249, %267 : vector<16x64xf32>
    %269 = vector.extract_strided_slice %255 {offsets = [0, 0], sizes = [16, 64], strides = [1, 1]} : vector<17x64xf32> to vector<16x64xf32>
    %270 = vector.broadcast %264 : vector<1x64xf32> to vector<16x64xf32>
    %271 = arith.mulf %269, %270 : vector<16x64xf32>
    %272 = arith.addf %268, %271 : vector<16x64xf32>
    %c0_102 = arith.constant 0 : index
    %c6 = arith.constant 6 : index
    %c0_103 = arith.constant 0 : index
    %c0_104 = arith.constant 0 : index
    %273 = vector.load %arg4[%c0_102, %c6, %c0_103, %c0_104] : memref<1x16x8x64xf32, #tpu.memory_space<vmem>>, vector<1x1x8x64xf32>
    %274 = vector.shape_cast %273 : vector<1x1x8x64xf32> to vector<8x64xf32>
    %cst_105 = arith.constant dense<0.000000e+00> : vector<16x64xf32>
    %275 = tpu.matmul %130, %274, %cst_105 {dimension_numbers = #tpu.dot_dimension_numbers<[1], [0], [0], [1], [0, 0, 1, 1], [], []>} : vector<16x8xf32>, vector<8x64xf32>, vector<16x64xf32> -> vector<16x64xf32>
    %cst_106 = arith.constant 0.000000e+00 : f32
    %276 = vector.broadcast %cst_106 : f32 to vector<16x64xf32>
    %277 = arith.maximumf %275, %276 : vector<16x64xf32>
    %cst_107 = arith.constant dense<0.000000e+00> : vector<17x64xf32>
    %278 = tpu.matmul %131, %277, %cst_107 {dimension_numbers = #tpu.dot_dimension_numbers<[1], [0], [0], [1], [0, 0, 1, 1], [], []>} : vector<17x16xf32>, vector<16x64xf32>, vector<17x64xf32> -> vector<17x64xf32>
    %279 = vector.extract_strided_slice %278 {offsets = [16, 0], sizes = [1, 64], strides = [1, 1]} : vector<17x64xf32> to vector<1x64xf32>
    %280 = arith.addf %279, %27 : vector<1x64xf32>
    %cst_108 = arith.constant 0.000000e+00 : f32
    %281 = vector.broadcast %cst_108 : f32 to vector<1x64xf32>
    %282 = arith.maximumf %280, %281 : vector<1x64xf32>
    %283 = arith.maximumf %260, %282 : vector<1x64xf32>
    %284 = arith.subf %260, %283 : vector<1x64xf32>
    %285 = math.exp %284 : vector<1x64xf32>
    %286 = arith.subf %282, %283 : vector<1x64xf32>
    %287 = math.exp %286 : vector<1x64xf32>
    %288 = arith.mulf %266, %285 : vector<1x64xf32>
    %289 = arith.addf %288, %287 : vector<1x64xf32>
    %290 = vector.broadcast %285 : vector<1x64xf32> to vector<16x64xf32>
    %291 = arith.mulf %272, %290 : vector<16x64xf32>
    %292 = vector.extract_strided_slice %278 {offsets = [0, 0], sizes = [16, 64], strides = [1, 1]} : vector<17x64xf32> to vector<16x64xf32>
    %293 = vector.broadcast %287 : vector<1x64xf32> to vector<16x64xf32>
    %294 = arith.mulf %292, %293 : vector<16x64xf32>
    %295 = arith.addf %291, %294 : vector<16x64xf32>
    %c0_109 = arith.constant 0 : index
    %c7 = arith.constant 7 : index
    %c0_110 = arith.constant 0 : index
    %c0_111 = arith.constant 0 : index
    %296 = vector.load %arg4[%c0_109, %c7, %c0_110, %c0_111] : memref<1x16x8x64xf32, #tpu.memory_space<vmem>>, vector<1x1x8x64xf32>
    %297 = vector.shape_cast %296 : vector<1x1x8x64xf32> to vector<8x64xf32>
    %cst_112 = arith.constant dense<0.000000e+00> : vector<16x64xf32>
    %298 = tpu.matmul %130, %297, %cst_112 {dimension_numbers = #tpu.dot_dimension_numbers<[1], [0], [0], [1], [0, 0, 1, 1], [], []>} : vector<16x8xf32>, vector<8x64xf32>, vector<16x64xf32> -> vector<16x64xf32>
    %cst_113 = arith.constant 0.000000e+00 : f32
    %299 = vector.broadcast %cst_113 : f32 to vector<16x64xf32>
    %300 = arith.maximumf %298, %299 : vector<16x64xf32>
    %cst_114 = arith.constant dense<0.000000e+00> : vector<17x64xf32>
    %301 = tpu.matmul %131, %300, %cst_114 {dimension_numbers = #tpu.dot_dimension_numbers<[1], [0], [0], [1], [0, 0, 1, 1], [], []>} : vector<17x16xf32>, vector<16x64xf32>, vector<17x64xf32> -> vector<17x64xf32>
    %302 = vector.extract_strided_slice %301 {offsets = [16, 0], sizes = [1, 64], strides = [1, 1]} : vector<17x64xf32> to vector<1x64xf32>
    %303 = arith.addf %302, %27 : vector<1x64xf32>
    %cst_115 = arith.constant 0.000000e+00 : f32
    %304 = vector.broadcast %cst_115 : f32 to vector<1x64xf32>
    %305 = arith.maximumf %303, %304 : vector<1x64xf32>
    %306 = arith.maximumf %283, %305 : vector<1x64xf32>
    %307 = arith.subf %283, %306 : vector<1x64xf32>
    %308 = math.exp %307 : vector<1x64xf32>
    %309 = arith.subf %305, %306 : vector<1x64xf32>
    %310 = math.exp %309 : vector<1x64xf32>
    %311 = arith.mulf %289, %308 : vector<1x64xf32>
    %312 = arith.addf %311, %310 : vector<1x64xf32>
    %313 = vector.broadcast %308 : vector<1x64xf32> to vector<16x64xf32>
    %314 = arith.mulf %295, %313 : vector<16x64xf32>
    %315 = vector.extract_strided_slice %301 {offsets = [0, 0], sizes = [16, 64], strides = [1, 1]} : vector<17x64xf32> to vector<16x64xf32>
    %316 = vector.broadcast %310 : vector<1x64xf32> to vector<16x64xf32>
    %317 = arith.mulf %315, %316 : vector<16x64xf32>
    %318 = arith.addf %314, %317 : vector<16x64xf32>
    %c0_116 = arith.constant 0 : index
    %c8 = arith.constant 8 : index
    %c0_117 = arith.constant 0 : index
    %c0_118 = arith.constant 0 : index
    %319 = vector.load %arg4[%c0_116, %c8, %c0_117, %c0_118] : memref<1x16x8x64xf32, #tpu.memory_space<vmem>>, vector<1x1x8x64xf32>
    %320 = vector.shape_cast %319 : vector<1x1x8x64xf32> to vector<8x64xf32>
    %cst_119 = arith.constant dense<0.000000e+00> : vector<16x64xf32>
    %321 = tpu.matmul %130, %320, %cst_119 {dimension_numbers = #tpu.dot_dimension_numbers<[1], [0], [0], [1], [0, 0, 1, 1], [], []>} : vector<16x8xf32>, vector<8x64xf32>, vector<16x64xf32> -> vector<16x64xf32>
    %cst_120 = arith.constant 0.000000e+00 : f32
    %322 = vector.broadcast %cst_120 : f32 to vector<16x64xf32>
    %323 = arith.maximumf %321, %322 : vector<16x64xf32>
    %cst_121 = arith.constant dense<0.000000e+00> : vector<17x64xf32>
    %324 = tpu.matmul %131, %323, %cst_121 {dimension_numbers = #tpu.dot_dimension_numbers<[1], [0], [0], [1], [0, 0, 1, 1], [], []>} : vector<17x16xf32>, vector<16x64xf32>, vector<17x64xf32> -> vector<17x64xf32>
    %325 = vector.extract_strided_slice %324 {offsets = [16, 0], sizes = [1, 64], strides = [1, 1]} : vector<17x64xf32> to vector<1x64xf32>
    %326 = arith.addf %325, %27 : vector<1x64xf32>
    %cst_122 = arith.constant 0.000000e+00 : f32
    %327 = vector.broadcast %cst_122 : f32 to vector<1x64xf32>
    %328 = arith.maximumf %326, %327 : vector<1x64xf32>
    %329 = arith.maximumf %306, %328 : vector<1x64xf32>
    %330 = arith.subf %306, %329 : vector<1x64xf32>
    %331 = math.exp %330 : vector<1x64xf32>
    %332 = arith.subf %328, %329 : vector<1x64xf32>
    %333 = math.exp %332 : vector<1x64xf32>
    %334 = arith.mulf %312, %331 : vector<1x64xf32>
    %335 = arith.addf %334, %333 : vector<1x64xf32>
    %336 = vector.broadcast %331 : vector<1x64xf32> to vector<16x64xf32>
    %337 = arith.mulf %318, %336 : vector<16x64xf32>
    %338 = vector.extract_strided_slice %324 {offsets = [0, 0], sizes = [16, 64], strides = [1, 1]} : vector<17x64xf32> to vector<16x64xf32>
    %339 = vector.broadcast %333 : vector<1x64xf32> to vector<16x64xf32>
    %340 = arith.mulf %338, %339 : vector<16x64xf32>
    %341 = arith.addf %337, %340 : vector<16x64xf32>
    %c0_123 = arith.constant 0 : index
    %c9 = arith.constant 9 : index
    %c0_124 = arith.constant 0 : index
    %c0_125 = arith.constant 0 : index
    %342 = vector.load %arg4[%c0_123, %c9, %c0_124, %c0_125] : memref<1x16x8x64xf32, #tpu.memory_space<vmem>>, vector<1x1x8x64xf32>
    %343 = vector.shape_cast %342 : vector<1x1x8x64xf32> to vector<8x64xf32>
    %cst_126 = arith.constant dense<0.000000e+00> : vector<16x64xf32>
    %344 = tpu.matmul %130, %343, %cst_126 {dimension_numbers = #tpu.dot_dimension_numbers<[1], [0], [0], [1], [0, 0, 1, 1], [], []>} : vector<16x8xf32>, vector<8x64xf32>, vector<16x64xf32> -> vector<16x64xf32>
    %cst_127 = arith.constant 0.000000e+00 : f32
    %345 = vector.broadcast %cst_127 : f32 to vector<16x64xf32>
    %346 = arith.maximumf %344, %345 : vector<16x64xf32>
    %cst_128 = arith.constant dense<0.000000e+00> : vector<17x64xf32>
    %347 = tpu.matmul %131, %346, %cst_128 {dimension_numbers = #tpu.dot_dimension_numbers<[1], [0], [0], [1], [0, 0, 1, 1], [], []>} : vector<17x16xf32>, vector<16x64xf32>, vector<17x64xf32> -> vector<17x64xf32>
    %348 = vector.extract_strided_slice %347 {offsets = [16, 0], sizes = [1, 64], strides = [1, 1]} : vector<17x64xf32> to vector<1x64xf32>
    %349 = arith.addf %348, %27 : vector<1x64xf32>
    %cst_129 = arith.constant 0.000000e+00 : f32
    %350 = vector.broadcast %cst_129 : f32 to vector<1x64xf32>
    %351 = arith.maximumf %349, %350 : vector<1x64xf32>
    %352 = arith.maximumf %329, %351 : vector<1x64xf32>
    %353 = arith.subf %329, %352 : vector<1x64xf32>
    %354 = math.exp %353 : vector<1x64xf32>
    %355 = arith.subf %351, %352 : vector<1x64xf32>
    %356 = math.exp %355 : vector<1x64xf32>
    %357 = arith.mulf %335, %354 : vector<1x64xf32>
    %358 = arith.addf %357, %356 : vector<1x64xf32>
    %359 = vector.broadcast %354 : vector<1x64xf32> to vector<16x64xf32>
    %360 = arith.mulf %341, %359 : vector<16x64xf32>
    %361 = vector.extract_strided_slice %347 {offsets = [0, 0], sizes = [16, 64], strides = [1, 1]} : vector<17x64xf32> to vector<16x64xf32>
    %362 = vector.broadcast %356 : vector<1x64xf32> to vector<16x64xf32>
    %363 = arith.mulf %361, %362 : vector<16x64xf32>
    %364 = arith.addf %360, %363 : vector<16x64xf32>
    %c0_130 = arith.constant 0 : index
    %c10 = arith.constant 10 : index
    %c0_131 = arith.constant 0 : index
    %c0_132 = arith.constant 0 : index
    %365 = vector.load %arg4[%c0_130, %c10, %c0_131, %c0_132] : memref<1x16x8x64xf32, #tpu.memory_space<vmem>>, vector<1x1x8x64xf32>
    %366 = vector.shape_cast %365 : vector<1x1x8x64xf32> to vector<8x64xf32>
    %cst_133 = arith.constant dense<0.000000e+00> : vector<16x64xf32>
    %367 = tpu.matmul %130, %366, %cst_133 {dimension_numbers = #tpu.dot_dimension_numbers<[1], [0], [0], [1], [0, 0, 1, 1], [], []>} : vector<16x8xf32>, vector<8x64xf32>, vector<16x64xf32> -> vector<16x64xf32>
    %cst_134 = arith.constant 0.000000e+00 : f32
    %368 = vector.broadcast %cst_134 : f32 to vector<16x64xf32>
    %369 = arith.maximumf %367, %368 : vector<16x64xf32>
    %cst_135 = arith.constant dense<0.000000e+00> : vector<17x64xf32>
    %370 = tpu.matmul %131, %369, %cst_135 {dimension_numbers = #tpu.dot_dimension_numbers<[1], [0], [0], [1], [0, 0, 1, 1], [], []>} : vector<17x16xf32>, vector<16x64xf32>, vector<17x64xf32> -> vector<17x64xf32>
    %371 = vector.extract_strided_slice %370 {offsets = [16, 0], sizes = [1, 64], strides = [1, 1]} : vector<17x64xf32> to vector<1x64xf32>
    %372 = arith.addf %371, %27 : vector<1x64xf32>
    %cst_136 = arith.constant 0.000000e+00 : f32
    %373 = vector.broadcast %cst_136 : f32 to vector<1x64xf32>
    %374 = arith.maximumf %372, %373 : vector<1x64xf32>
    %375 = arith.maximumf %352, %374 : vector<1x64xf32>
    %376 = arith.subf %352, %375 : vector<1x64xf32>
    %377 = math.exp %376 : vector<1x64xf32>
    %378 = arith.subf %374, %375 : vector<1x64xf32>
    %379 = math.exp %378 : vector<1x64xf32>
    %380 = arith.mulf %358, %377 : vector<1x64xf32>
    %381 = arith.addf %380, %379 : vector<1x64xf32>
    %382 = vector.broadcast %377 : vector<1x64xf32> to vector<16x64xf32>
    %383 = arith.mulf %364, %382 : vector<16x64xf32>
    %384 = vector.extract_strided_slice %370 {offsets = [0, 0], sizes = [16, 64], strides = [1, 1]} : vector<17x64xf32> to vector<16x64xf32>
    %385 = vector.broadcast %379 : vector<1x64xf32> to vector<16x64xf32>
    %386 = arith.mulf %384, %385 : vector<16x64xf32>
    %387 = arith.addf %383, %386 : vector<16x64xf32>
    %c0_137 = arith.constant 0 : index
    %c11 = arith.constant 11 : index
    %c0_138 = arith.constant 0 : index
    %c0_139 = arith.constant 0 : index
    %388 = vector.load %arg4[%c0_137, %c11, %c0_138, %c0_139] : memref<1x16x8x64xf32, #tpu.memory_space<vmem>>, vector<1x1x8x64xf32>
    %389 = vector.shape_cast %388 : vector<1x1x8x64xf32> to vector<8x64xf32>
    %cst_140 = arith.constant dense<0.000000e+00> : vector<16x64xf32>
    %390 = tpu.matmul %130, %389, %cst_140 {dimension_numbers = #tpu.dot_dimension_numbers<[1], [0], [0], [1], [0, 0, 1, 1], [], []>} : vector<16x8xf32>, vector<8x64xf32>, vector<16x64xf32> -> vector<16x64xf32>
    %cst_141 = arith.constant 0.000000e+00 : f32
    %391 = vector.broadcast %cst_141 : f32 to vector<16x64xf32>
    %392 = arith.maximumf %390, %391 : vector<16x64xf32>
    %cst_142 = arith.constant dense<0.000000e+00> : vector<17x64xf32>
    %393 = tpu.matmul %131, %392, %cst_142 {dimension_numbers = #tpu.dot_dimension_numbers<[1], [0], [0], [1], [0, 0, 1, 1], [], []>} : vector<17x16xf32>, vector<16x64xf32>, vector<17x64xf32> -> vector<17x64xf32>
    %394 = vector.extract_strided_slice %393 {offsets = [16, 0], sizes = [1, 64], strides = [1, 1]} : vector<17x64xf32> to vector<1x64xf32>
    %395 = arith.addf %394, %27 : vector<1x64xf32>
    %cst_143 = arith.constant 0.000000e+00 : f32
    %396 = vector.broadcast %cst_143 : f32 to vector<1x64xf32>
    %397 = arith.maximumf %395, %396 : vector<1x64xf32>
    %398 = arith.maximumf %375, %397 : vector<1x64xf32>
    %399 = arith.subf %375, %398 : vector<1x64xf32>
    %400 = math.exp %399 : vector<1x64xf32>
    %401 = arith.subf %397, %398 : vector<1x64xf32>
    %402 = math.exp %401 : vector<1x64xf32>
    %403 = arith.mulf %381, %400 : vector<1x64xf32>
    %404 = arith.addf %403, %402 : vector<1x64xf32>
    %405 = vector.broadcast %400 : vector<1x64xf32> to vector<16x64xf32>
    %406 = arith.mulf %387, %405 : vector<16x64xf32>
    %407 = vector.extract_strided_slice %393 {offsets = [0, 0], sizes = [16, 64], strides = [1, 1]} : vector<17x64xf32> to vector<16x64xf32>
    %408 = vector.broadcast %402 : vector<1x64xf32> to vector<16x64xf32>
    %409 = arith.mulf %407, %408 : vector<16x64xf32>
    %410 = arith.addf %406, %409 : vector<16x64xf32>
    %c0_144 = arith.constant 0 : index
    %c12 = arith.constant 12 : index
    %c0_145 = arith.constant 0 : index
    %c0_146 = arith.constant 0 : index
    %411 = vector.load %arg4[%c0_144, %c12, %c0_145, %c0_146] : memref<1x16x8x64xf32, #tpu.memory_space<vmem>>, vector<1x1x8x64xf32>
    %412 = vector.shape_cast %411 : vector<1x1x8x64xf32> to vector<8x64xf32>
    %cst_147 = arith.constant dense<0.000000e+00> : vector<16x64xf32>
    %413 = tpu.matmul %130, %412, %cst_147 {dimension_numbers = #tpu.dot_dimension_numbers<[1], [0], [0], [1], [0, 0, 1, 1], [], []>} : vector<16x8xf32>, vector<8x64xf32>, vector<16x64xf32> -> vector<16x64xf32>
    %cst_148 = arith.constant 0.000000e+00 : f32
    %414 = vector.broadcast %cst_148 : f32 to vector<16x64xf32>
    %415 = arith.maximumf %413, %414 : vector<16x64xf32>
    %cst_149 = arith.constant dense<0.000000e+00> : vector<17x64xf32>
    %416 = tpu.matmul %131, %415, %cst_149 {dimension_numbers = #tpu.dot_dimension_numbers<[1], [0], [0], [1], [0, 0, 1, 1], [], []>} : vector<17x16xf32>, vector<16x64xf32>, vector<17x64xf32> -> vector<17x64xf32>
    %417 = vector.extract_strided_slice %416 {offsets = [16, 0], sizes = [1, 64], strides = [1, 1]} : vector<17x64xf32> to vector<1x64xf32>
    %418 = arith.addf %417, %27 : vector<1x64xf32>
    %cst_150 = arith.constant 0.000000e+00 : f32
    %419 = vector.broadcast %cst_150 : f32 to vector<1x64xf32>
    %420 = arith.maximumf %418, %419 : vector<1x64xf32>
    %421 = arith.maximumf %398, %420 : vector<1x64xf32>
    %422 = arith.subf %398, %421 : vector<1x64xf32>
    %423 = math.exp %422 : vector<1x64xf32>
    %424 = arith.subf %420, %421 : vector<1x64xf32>
    %425 = math.exp %424 : vector<1x64xf32>
    %426 = arith.mulf %404, %423 : vector<1x64xf32>
    %427 = arith.addf %426, %425 : vector<1x64xf32>
    %428 = vector.broadcast %423 : vector<1x64xf32> to vector<16x64xf32>
    %429 = arith.mulf %410, %428 : vector<16x64xf32>
    %430 = vector.extract_strided_slice %416 {offsets = [0, 0], sizes = [16, 64], strides = [1, 1]} : vector<17x64xf32> to vector<16x64xf32>
    %431 = vector.broadcast %425 : vector<1x64xf32> to vector<16x64xf32>
    %432 = arith.mulf %430, %431 : vector<16x64xf32>
    %433 = arith.addf %429, %432 : vector<16x64xf32>
    %c0_151 = arith.constant 0 : index
    %c13 = arith.constant 13 : index
    %c0_152 = arith.constant 0 : index
    %c0_153 = arith.constant 0 : index
    %434 = vector.load %arg4[%c0_151, %c13, %c0_152, %c0_153] : memref<1x16x8x64xf32, #tpu.memory_space<vmem>>, vector<1x1x8x64xf32>
    %435 = vector.shape_cast %434 : vector<1x1x8x64xf32> to vector<8x64xf32>
    %cst_154 = arith.constant dense<0.000000e+00> : vector<16x64xf32>
    %436 = tpu.matmul %130, %435, %cst_154 {dimension_numbers = #tpu.dot_dimension_numbers<[1], [0], [0], [1], [0, 0, 1, 1], [], []>} : vector<16x8xf32>, vector<8x64xf32>, vector<16x64xf32> -> vector<16x64xf32>
    %cst_155 = arith.constant 0.000000e+00 : f32
    %437 = vector.broadcast %cst_155 : f32 to vector<16x64xf32>
    %438 = arith.maximumf %436, %437 : vector<16x64xf32>
    %cst_156 = arith.constant dense<0.000000e+00> : vector<17x64xf32>
    %439 = tpu.matmul %131, %438, %cst_156 {dimension_numbers = #tpu.dot_dimension_numbers<[1], [0], [0], [1], [0, 0, 1, 1], [], []>} : vector<17x16xf32>, vector<16x64xf32>, vector<17x64xf32> -> vector<17x64xf32>
    %440 = vector.extract_strided_slice %439 {offsets = [16, 0], sizes = [1, 64], strides = [1, 1]} : vector<17x64xf32> to vector<1x64xf32>
    %441 = arith.addf %440, %27 : vector<1x64xf32>
    %cst_157 = arith.constant 0.000000e+00 : f32
    %442 = vector.broadcast %cst_157 : f32 to vector<1x64xf32>
    %443 = arith.maximumf %441, %442 : vector<1x64xf32>
    %444 = arith.maximumf %421, %443 : vector<1x64xf32>
    %445 = arith.subf %421, %444 : vector<1x64xf32>
    %446 = math.exp %445 : vector<1x64xf32>
    %447 = arith.subf %443, %444 : vector<1x64xf32>
    %448 = math.exp %447 : vector<1x64xf32>
    %449 = arith.mulf %427, %446 : vector<1x64xf32>
    %450 = arith.addf %449, %448 : vector<1x64xf32>
    %451 = vector.broadcast %446 : vector<1x64xf32> to vector<16x64xf32>
    %452 = arith.mulf %433, %451 : vector<16x64xf32>
    %453 = vector.extract_strided_slice %439 {offsets = [0, 0], sizes = [16, 64], strides = [1, 1]} : vector<17x64xf32> to vector<16x64xf32>
    %454 = vector.broadcast %448 : vector<1x64xf32> to vector<16x64xf32>
    %455 = arith.mulf %453, %454 : vector<16x64xf32>
    %456 = arith.addf %452, %455 : vector<16x64xf32>
    %c0_158 = arith.constant 0 : index
    %c14 = arith.constant 14 : index
    %c0_159 = arith.constant 0 : index
    %c0_160 = arith.constant 0 : index
    %457 = vector.load %arg4[%c0_158, %c14, %c0_159, %c0_160] : memref<1x16x8x64xf32, #tpu.memory_space<vmem>>, vector<1x1x8x64xf32>
    %458 = vector.shape_cast %457 : vector<1x1x8x64xf32> to vector<8x64xf32>
    %cst_161 = arith.constant dense<0.000000e+00> : vector<16x64xf32>
    %459 = tpu.matmul %130, %458, %cst_161 {dimension_numbers = #tpu.dot_dimension_numbers<[1], [0], [0], [1], [0, 0, 1, 1], [], []>} : vector<16x8xf32>, vector<8x64xf32>, vector<16x64xf32> -> vector<16x64xf32>
    %cst_162 = arith.constant 0.000000e+00 : f32
    %460 = vector.broadcast %cst_162 : f32 to vector<16x64xf32>
    %461 = arith.maximumf %459, %460 : vector<16x64xf32>
    %cst_163 = arith.constant dense<0.000000e+00> : vector<17x64xf32>
    %462 = tpu.matmul %131, %461, %cst_163 {dimension_numbers = #tpu.dot_dimension_numbers<[1], [0], [0], [1], [0, 0, 1, 1], [], []>} : vector<17x16xf32>, vector<16x64xf32>, vector<17x64xf32> -> vector<17x64xf32>
    %463 = vector.extract_strided_slice %462 {offsets = [16, 0], sizes = [1, 64], strides = [1, 1]} : vector<17x64xf32> to vector<1x64xf32>
    %464 = arith.addf %463, %27 : vector<1x64xf32>
    %cst_164 = arith.constant 0.000000e+00 : f32
    %465 = vector.broadcast %cst_164 : f32 to vector<1x64xf32>
    %466 = arith.maximumf %464, %465 : vector<1x64xf32>
    %467 = arith.maximumf %444, %466 : vector<1x64xf32>
    %468 = arith.subf %444, %467 : vector<1x64xf32>
    %469 = math.exp %468 : vector<1x64xf32>
    %470 = arith.subf %466, %467 : vector<1x64xf32>
    %471 = math.exp %470 : vector<1x64xf32>
    %472 = arith.mulf %450, %469 : vector<1x64xf32>
    %473 = arith.addf %472, %471 : vector<1x64xf32>
    %474 = vector.broadcast %469 : vector<1x64xf32> to vector<16x64xf32>
    %475 = arith.mulf %456, %474 : vector<16x64xf32>
    %476 = vector.extract_strided_slice %462 {offsets = [0, 0], sizes = [16, 64], strides = [1, 1]} : vector<17x64xf32> to vector<16x64xf32>
    %477 = vector.broadcast %471 : vector<1x64xf32> to vector<16x64xf32>
    %478 = arith.mulf %476, %477 : vector<16x64xf32>
    %479 = arith.addf %475, %478 : vector<16x64xf32>
    %c0_165 = arith.constant 0 : index
    %c15 = arith.constant 15 : index
    %c0_166 = arith.constant 0 : index
    %c0_167 = arith.constant 0 : index
    %480 = vector.load %arg4[%c0_165, %c15, %c0_166, %c0_167] : memref<1x16x8x64xf32, #tpu.memory_space<vmem>>, vector<1x1x8x64xf32>
    %481 = vector.shape_cast %480 : vector<1x1x8x64xf32> to vector<8x64xf32>
    %cst_168 = arith.constant dense<0.000000e+00> : vector<16x64xf32>
    %482 = tpu.matmul %130, %481, %cst_168 {dimension_numbers = #tpu.dot_dimension_numbers<[1], [0], [0], [1], [0, 0, 1, 1], [], []>} : vector<16x8xf32>, vector<8x64xf32>, vector<16x64xf32> -> vector<16x64xf32>
    %cst_169 = arith.constant 0.000000e+00 : f32
    %483 = vector.broadcast %cst_169 : f32 to vector<16x64xf32>
    %484 = arith.maximumf %482, %483 : vector<16x64xf32>
    %cst_170 = arith.constant dense<0.000000e+00> : vector<17x64xf32>
    %485 = tpu.matmul %131, %484, %cst_170 {dimension_numbers = #tpu.dot_dimension_numbers<[1], [0], [0], [1], [0, 0, 1, 1], [], []>} : vector<17x16xf32>, vector<16x64xf32>, vector<17x64xf32> -> vector<17x64xf32>
    %486 = vector.extract_strided_slice %485 {offsets = [16, 0], sizes = [1, 64], strides = [1, 1]} : vector<17x64xf32> to vector<1x64xf32>
    %487 = arith.addf %486, %27 : vector<1x64xf32>
    %cst_171 = arith.constant 0.000000e+00 : f32
    %488 = vector.broadcast %cst_171 : f32 to vector<1x64xf32>
    %489 = arith.maximumf %487, %488 : vector<1x64xf32>
    %490 = arith.maximumf %467, %489 : vector<1x64xf32>
    %491 = arith.subf %467, %490 : vector<1x64xf32>
    %492 = math.exp %491 : vector<1x64xf32>
    %493 = arith.subf %489, %490 : vector<1x64xf32>
    %494 = math.exp %493 : vector<1x64xf32>
    %495 = arith.mulf %473, %492 : vector<1x64xf32>
    %496 = arith.addf %495, %494 : vector<1x64xf32>
    %497 = vector.broadcast %492 : vector<1x64xf32> to vector<16x64xf32>
    %498 = arith.mulf %479, %497 : vector<16x64xf32>
    %499 = vector.extract_strided_slice %485 {offsets = [0, 0], sizes = [16, 64], strides = [1, 1]} : vector<17x64xf32> to vector<16x64xf32>
    %500 = vector.broadcast %494 : vector<1x64xf32> to vector<16x64xf32>
    %501 = arith.mulf %499, %500 : vector<16x64xf32>
    %502 = arith.addf %498, %501 : vector<16x64xf32>
    %cst_172 = arith.constant 1.000000e+00 : f32
    %503 = vector.broadcast %cst_172 : f32 to vector<1x64xf32>
    %504 = arith.divf %503, %496 : vector<1x64xf32>
    %505 = vector.broadcast %504 : vector<1x64xf32> to vector<16x64xf32>
    %506 = arith.mulf %502, %505 : vector<16x64xf32>
    %507 = arith.mulf %506, %19 : vector<16x64xf32>
    %508 = arith.negf %129 : vector<16x64xf32>
    %509 = math.exp %508 : vector<16x64xf32>
    %cst_173 = arith.constant 1.000000e+00 : f32
    %510 = vector.broadcast %cst_173 : f32 to vector<16x64xf32>
    %511 = arith.addf %510, %509 : vector<16x64xf32>
    %512 = arith.divf %510, %511 : vector<16x64xf32>
    %513 = arith.negf %507 : vector<16x64xf32>
    %514 = math.exp %513 : vector<16x64xf32>
    %cst_174 = arith.constant 1.000000e+00 : f32
    %515 = vector.broadcast %cst_174 : f32 to vector<16x64xf32>
    %516 = arith.addf %515, %514 : vector<16x64xf32>
    %517 = arith.divf %515, %516 : vector<16x64xf32>
    %518 = arith.negf %25 : vector<16x64xf32>
    %519 = math.exp %518 : vector<16x64xf32>
    %cst_175 = arith.constant 1.000000e+00 : f32
    %520 = vector.broadcast %cst_175 : f32 to vector<16x64xf32>
    %521 = arith.addf %520, %519 : vector<16x64xf32>
    %522 = arith.divf %520, %521 : vector<16x64xf32>
    %523 = tpu.concatenate %512, %517, %522 in 0 : vector<16x64xf32>, vector<16x64xf32>, vector<16x64xf32> -> vector<48x64xf32>
    %c0_176 = arith.constant 0 : index
    %c0_177 = arith.constant 0 : index
    %524 = vector.load %arg11[%c0_176, %c0_177] : memref<16x48xf32, #tpu.memory_space<vmem>>, vector<16x48xf32>
    %cst_178 = arith.constant dense<0.000000e+00> : vector<16x64xf32>
    %525 = tpu.matmul %524, %523, %cst_178 {dimension_numbers = #tpu.dot_dimension_numbers<[1], [0], [0], [1], [0, 0, 1, 1], [], []>} : vector<16x48xf32>, vector<48x64xf32>, vector<16x64xf32> -> vector<16x64xf32>
    %cst_179 = arith.constant 0.000000e+00 : f32
    %526 = vector.broadcast %cst_179 : f32 to vector<16x64xf32>
    %527 = arith.maximumf %525, %526 : vector<16x64xf32>
    %c0_180 = arith.constant 0 : index
    %c0_181 = arith.constant 0 : index
    %528 = vector.load %arg12[%c0_180, %c0_181] : memref<16x16xf32, #tpu.memory_space<vmem>>, vector<16x16xf32>
    %cst_182 = arith.constant dense<0.000000e+00> : vector<16x64xf32>
    %529 = tpu.matmul %528, %527, %cst_182 {dimension_numbers = #tpu.dot_dimension_numbers<[1], [0], [0], [1], [0, 0, 1, 1], [], []>} : vector<16x16xf32>, vector<16x64xf32>, vector<16x64xf32> -> vector<16x64xf32>
    %c0_183 = arith.constant 0 : index
    %c0_184 = arith.constant 0 : index
    %c0_185 = arith.constant 0 : index
    %530 = vector.load %arg13[%c0_183, %c0_184, %c0_185] : memref<1x16x64xf32, #tpu.memory_space<vmem>>, vector<1x16x64xf32>
    %531 = vector.shape_cast %530 : vector<1x16x64xf32> to vector<16x64xf32>
    %532 = vector.shape_cast %529 : vector<16x64xf32> to vector<1x16x64xf32>
    tpu.vector_store %arg13[%c0_183, %c0_184, %c0_185], %532 {strides = array<i32>} : memref<1x16x64xf32, #tpu.memory_space<vmem>>, vector<1x16x64xf32>,
    return
  }
  func.func @transform_0(%arg0: i32, %arg1: i32) -> (i32, i32, i32) {
    %c0_i32 = arith.constant 0 : i32
    %c0_i32_0 = arith.constant 0 : i32
    return %arg0, %c0_i32, %arg1 : i32, i32, i32
  }
  func.func @transform_1(%arg0: i32, %arg1: i32) -> (i32, i32, i32, i32) {
    %c0_i32 = arith.constant 0 : i32
    %c0_i32_0 = arith.constant 0 : i32
    %c0_i32_1 = arith.constant 0 : i32
    return %arg0, %c0_i32, %c0_i32_0, %arg1 : i32, i32, i32, i32
  }
  func.func @transform_2(%arg0: i32, %arg1: i32) -> (i32, i32, i32, i32) {
    %c0_i32 = arith.constant 0 : i32
    %c0_i32_0 = arith.constant 0 : i32
    %c0_i32_1 = arith.constant 0 : i32
    return %arg0, %c0_i32, %c0_i32_0, %arg1 : i32, i32, i32, i32
  }
  func.func @transform_3(%arg0: i32, %arg1: i32) -> (i32, i32) {
    %c0_i32 = arith.constant 0 : i32
    %c0_i32_0 = arith.constant 0 : i32
    %c0_i32_1 = arith.constant 0 : i32
    return %c0_i32, %c0_i32_0 : i32, i32
  }
  func.func @transform_4(%arg0: i32, %arg1: i32) -> (i32, i32) {
    %c0_i32 = arith.constant 0 : i32
    %c0_i32_0 = arith.constant 0 : i32
    %c0_i32_1 = arith.constant 0 : i32
    return %c0_i32, %c0_i32_0 : i32, i32
  }
  func.func @transform_5(%arg0: i32, %arg1: i32) -> (i32, i32) {
    %c0_i32 = arith.constant 0 : i32
    %c0_i32_0 = arith.constant 0 : i32
    %c0_i32_1 = arith.constant 0 : i32
    return %c0_i32, %c0_i32_0 : i32, i32
  }
  func.func @transform_6(%arg0: i32, %arg1: i32) -> (i32, i32) {
    %c0_i32 = arith.constant 0 : i32
    %c0_i32_0 = arith.constant 0 : i32
    %c0_i32_1 = arith.constant 0 : i32
    return %c0_i32, %c0_i32_0 : i32, i32
  }
  func.func @transform_7(%arg0: i32, %arg1: i32) -> (i32, i32) {
    %c0_i32 = arith.constant 0 : i32
    %c0_i32_0 = arith.constant 0 : i32
    %c0_i32_1 = arith.constant 0 : i32
    return %c0_i32, %c0_i32_0 : i32, i32
  }
  func.func @transform_8(%arg0: i32, %arg1: i32) -> (i32, i32) {
    %c0_i32 = arith.constant 0 : i32
    %c0_i32_0 = arith.constant 0 : i32
    %c0_i32_1 = arith.constant 0 : i32
    return %c0_i32, %c0_i32_0 : i32, i32
  }
  func.func @transform_9(%arg0: i32, %arg1: i32) -> (i32, i32) {
    %c0_i32 = arith.constant 0 : i32
    %c0_i32_0 = arith.constant 0 : i32
    %c0_i32_1 = arith.constant 0 : i32
    return %c0_i32, %c0_i32_0 : i32, i32
  }
  func.func @transform_10(%arg0: i32, %arg1: i32) -> (i32, i32) {
    %c0_i32 = arith.constant 0 : i32
    %c0_i32_0 = arith.constant 0 : i32
    %c0_i32_1 = arith.constant 0 : i32
    return %c0_i32, %c0_i32_0 : i32, i32
  }
  func.func @transform_11(%arg0: i32, %arg1: i32) -> (i32, i32, i32) {
    %c0_i32 = arith.constant 0 : i32
    %c0_i32_0 = arith.constant 0 : i32
    return %arg0, %c0_i32, %arg1 : i32, i32, i32
  }
}

</mosaic_0001>

<bundles_post_ra>
// kernel: tpu_custom_call.1
= control target key start
LH: loop header
LB: loop body
LE: loop exit
PB: predicated region body
PF: predicated region fallthrough
CT: control target
= control target key end

     0   :  { %s3848_s0 = inlined_call_operand.vmem [shape: f32[2,16,64], index: 0, kind: input, shape index: {}]   ;;  %s3849_s1 = inlined_call_operand.vmem [shape: f32[2,4,8,64], index: 1, kind: input, shape index: {}]   ;;  %s3850_s2 = inlined_call_operand.hbm [shape: f32[2,16,8,64], index: 2, kind: input, shape index: {}]   ;;  %s3851_s3 = inlined_call_operand.vmem [shape: f32[48,16], index: 3, kind: input, shape index: {}]   ;;  %s3852_s4 = inlined_call_operand.vmem [shape: f32[18,16], index: 4, kind: input, shape index: {}]   ;;  %s3853_s5 = inlined_call_operand.vmem [shape: f32[16,8], index: 5, kind: input, shape index: {}]   ;;  %s3854_s6 = inlined_call_operand.vmem [shape: f32[17,16], index: 6, kind: input, shape index: {}]   ;;  %s3855_s7 = inlined_call_operand.vmem [shape: f32[16,8], index: 7, kind: input, shape index: {}]   ;;  %s3856_s8 = inlined_call_operand.vmem [shape: f32[17,16], index: 8, kind: input, shape index: {}]   ;;  %s3857_s9 = inlined_call_operand.vmem [shape: f32[16,48], index: 9, kind: input, shape index: {}]   ;;  %s3858_s10 = inlined_call_operand.vmem [shape: f32[16,16], index: 10, kind: input, shape index: {}]   ;;  %s3859_s11 = inlined_call_operand.hbm [shape: f32[2,16,64], index: 11, kind: output, shape index: {}]  }
   0x1   :  { %3866 = sst [smem:[#allocation13_spill]] %s3859_s11 }
   0x2   :  { %16 = vsyncpa [#allocation3], 0 }
   0x3   :  { %18 = vsyncpa [#allocation3 + $0x1], 0 }
   0x4   :  { %19 = vsyncpa [#allocation4], 0 }
   0x5   :  { %21 = vsyncpa [#allocation4 + $0x1], 0  ;;  %s3046_s17 = smov 0   ;;  %s3048_s18 = smov 0  }
   0x6   :  { %s3050_s19 = smov 0   ;;  %s3052_s20 = smov 0  }
   0x7   :  { %s3054_s21 = smov 0   ;;  %s3056_s22 = smov 0  }
   0x8 LB: > { %3867 = sst [smem:[#allocation8_spill]] %s2960_s17  ;;  %s2508_s23 = sadd.s32 4294967295, %s2980_s22   ;;  %s2980_s22 = sphi %s3056_s22, %s27_s22   ;;  %s2976_s21 = sphi %s3054_s21, %s3893_s21   ;;  %s2972_s20 = sphi %s3052_s20, %s3892_s20   ;;  %s2968_s19 = sphi %s3050_s19, %s3896_s19   ;;  %s2964_s18 = sphi %s3048_s18, %s3895_s18   ;;  %s2960_s17 = sphi %s3046_s17, %s3894_s17  }
   0x9   : > { %3868 = sst [smem:[#allocation9_spill]] %s2976_s21  ;;  %s2509_s24 = sadd.s32 4294967294, %s2980_s22  }
   0xa   : > { %s39_s25 = sadd.s32 1, %s2976_s21  ;;  %s104_s26 = sadd.s32 1, %s2968_s19 }
   0xb   : > { %p41_p0 = scmp.ge.s32.totalorder %s39_s25, 2  ;;  %p111_p1 = scmp.ne.s32.totalorder %s2968_s19, %s2964_s18 }
   0xc   : > { %p112_p2 = scmp.eq.s32.totalorder %s2980_s22, 0  ;;  %p117_p3 = scmp.ne.s32.totalorder %s2964_s18, %s2960_s17 }
   0xd   : > { %s3898_s25 = smov (%p41_p0, %s39_s25), 0  ;;  %p118_p5 = scmp.eq.s32.totalorder %s2508_s23, 0 }
   0xe   : > { %3869 = sst [smem:[#allocation10_spill]] %s3898_s25  ;;  %p3087_p4 = por %p112_p2, %p111_p1 }
   0xf   : > { %s99_s28 = ssub.s32 %s2976_s21, %s3898_s25  ;;  %p311_p6 = scmp.eq.s32.totalorder %s2508_s23, 1 }
  0x10   : > { %p102_p7 = scmp.eq.s32.totalorder %s99_s28, 0  ;;  %p3093_p8 = por %p118_p5, %p117_p3 }
  0x11   : > { %p3097_p9 = por %p311_p6, %p111_p1  ;;  %p317_p10 = scmp.eq.s32.totalorder %s2509_s24, 1 }
  0x12   : > { %s3102_s12 = scalar_select %p102_p7, %s2968_s19, %s104_s26  }
  0x13   : > { %s3872_s30 = scalar_select %p3097_p9, 1, 0 }
  0x14   : > { %3874 = sst [smem:[#allocation12_spill]] %s3102_s12  ;;  %p3104_p11 = por %p317_p10, %p117_p3 }
  0x15   : > { %3873 = sst [smem:[#allocation11_spill]] %s3872_s30  ;;  %p2511_p12 = scmp.ge.s32.totalorder %s2980_s22, 2 }
  0x16   : > { %p2685_p13 = scmp.lt.s32.totalorder %s2980_s22, 2  ;;  %s383_s14 = sand.u32 1, %s2968_s19  }
  0x17   : > { %s2512_s15 = sshll.u32 %s383_s14, 7  ;;  %s2668_s16 = sshll.u32 %s2976_s21, 7 }
  0x18   : > { %s393_s25 = scalar_lea.hbm %s3850_s2, %s2668_s16  ;;  %s387_s17 = scalar_lea.vmem [#allocation2], %s2512_s15 }
  0x19   : > { %s396_s11 = sshll.u32 %s387_s17, 4  ;;  %s394_s30 = sshll.u32 %s393_s25, 4  ;;  %s397_s11 = int_to_ptr.vmem [resolvable:$true] %s396_s11  ;;  %s395_s30 = int_to_ptr.hbm [resolvable:$true] %s394_s30 }
  0x1a   : > { %p2678_p0 = pnand %p2685_p13, %p3087_p4  ;;  %p2515_p1 = scmp.ge.s32.totalorder %s2980_s22, 1 }
  0x1b   : > { %s384_s24 = scalar_lea.sflag [#allocation3], %s383_s14  ;;  %s2982_s26 = smov 128  }
  0x1c   : > { %s2983_s12 = smov 8   ;;  %p404_p2 = scmp.lt.s32.totalorder %s2980_s22, 3 }
  0x1d   : > { %2680 = dma.hbm_to_vmem [thread:$0]  (!%p2678_p0), %s395_s30, 2048, %s397_s11, %s384_s24, %s2982_s26, %s2982_s26, %s2983_s12  }
  0x1e   : > { %p405_p3 = pnand %p2515_p1, %p404_p2 }
  0x1f   : > { %s3120_s21 = sand.u32 (!%p405_p3), 1, %s2964_s18  }
  0x20   : > { %408 = sbr.rel (%p405_p3) target bundleno = 1721 (0x6b9), region = 64  ;;  %s2516_s17 = sshll.u32 (!%p405_p3), %s3120_s21, 7 }
  0x21   : > { %s411_s25 = scalar_lea.sflag (!%p405_p3), [#allocation3], %s3120_s21  ;;  %s3124_s15 = scalar_lea.vmem (!%p405_p3), [#allocation2], %s2516_s17 }
  0x25   : > { %2951 = dma.done.wait (%p3093_p8), %s411_s25, 2048  }
  0x26   : > { %2953 = vsyncadd (%p3093_p8), %s411_s25, 4294965248  ;;  %p470_p4 = scmp.lt.s32.totalorder %s2972_s20, 1  ;;  %vm674_vm0 = vcmask 64512   ;;  %v668_v2 = vld [vmem:[%s3853_s5] sm:$0xff]  ;;  %vm494_vm1 = vcmask 130048   ;;  %v669_v6 = vld [vmem:[%s3853_s5 + $0x8] sm:$0xff] }
  0x27   : > { %v488_v4 = vld [vmem:[%s3851_s3] sm:$0xff]  ;;  %v489_v7 = vld [vmem:[%s3851_s3 + $0x8] sm:$0xff]  ;;  %v630_v23 = vld [vmem:[%s3852_s4 + $0x10] sm:$0x3]  ;;  %s2517_s25 = sshll.u32 %s3120_s21, 4  ;;  %s3889_s14 = sld [smem:[#allocation13_spill]] }
  0x28   : > { %s471_s11 = scalar_select %p470_p4, %s2972_s20, 1  ;;  %v628_v13 = vld [vmem:[%s3852_s4] sm:$0xff]  ;;  %v629_v19 = vld [vmem:[%s3852_s4 + $0x8] sm:$0xff]  ;;  %v3191_v27 = vld [vmem:[%s3854_s6 + $0x10] sm:$0x1] }
  0x29   : > { %v3167_v17 = vld [vmem:[%s3854_s6] sm:$0xff]  ;;  %v3180_v22 = vld [vmem:[%s3854_s6 + $0x8] sm:$0xff]  ;;  %v490_v33 = vld [vmem:[%s3851_s3 + $0x10] sm:$0xff] }
  0x2a   : > { %s2669_s27 = sshll.u32 %s471_s11, 4  ;;  %s2670_s30 = sshll.u32 %s471_s11, 5  ;;  %v1000_v28 = vld [vmem:[%s3124_s15] sm:$0xff]  ;;  %v2563_v29 = vld [vmem:[%s3124_s15 + $0x8] sm:$0xff]  ;;  %v491_v35 = vld [vmem:[%s3851_s3 + $0x18] sm:$0xff] }
  0x2b   : > { %s477_s16 = scalar_lea.vmem %s3848_s0, %s2669_s27  ;;  %s3138_s24 = scalar_lea.vmem %s3849_s1, %s2670_s30  ;;  %v3209_v30 = vld [vmem:[%s3855_s7] sm:$0xff]  ;;  %v3217_v31 = vld [vmem:[%s3855_s7 + $0x8] sm:$0xff]  ;;  %v2569_v63 = vld [vmem:[%s3124_s15 + $0x10] sm:$0xff] }
  0x2c   : > { %v487_v0 = vld [vmem:[%s477_s16 + $0x8] sm:$0xff]  ;;  %v673_v1 = vld [vmem:[%s3138_s24] sm:$0xff]  ;;  %v2546_v18 = vld [vmem:[%s3138_s24 + $0x10] sm:$0xff]  ;;  %s2671_s11 = sshll.u32 %s2972_s20, 4 }
  0x2d   : > { %527 = vmatpush.msra.mxu0 %v487_v0  ;;  %696 = vmatpush.msra.mxu2 %v673_v1  ;;  %v486_v3 = vld [vmem:[%s477_s16] sm:$0xff]  ;;  %v2540_v5 = vld [vmem:[%s3138_s24 + $0x8] sm:$0xff]  ;;  %v2552_v21 = vld [vmem:[%s3138_s24 + $0x18] sm:$0xff]  ;;  %s469_s24 = scalar_lea.vmem [#allocation5], %s2517_s25  ;;  %s2383_s16 = scalar_lea.hbm %s3889_s14, %s2671_s11 }
  0x2e   : > { %2535 = vmatmul.msk.f32.vlgmr.msra.gmra.mxu2 %vm674_vm0, %v668_v2  ;;  %v492_v38 = vld [vmem:[%s3851_s3 + $0x20] sm:$0xff]  ;;  %v493_v41 = vld [vmem:[%s3851_s3 + $0x28] sm:$0xff]  ;;  %s2384_s23 = sshll.u32 %s469_s24, 4  ;;  %s2386_s28 = sshll.u32 %s2383_s16, 4  ;;  %s2385_s23 = int_to_ptr.vmem [resolvable:$true] %s2384_s23  ;;  %s2387_s28 = int_to_ptr.hbm [resolvable:$true] %s2386_s28 }
  0x2f   : > { %528 = vmatpush.msra.mxu0 %v486_v3  ;;  %776 = vmatpush.msrb.mxu2 %v2540_v5  ;;  %s2912_s29 = sshra.s32 %s2387_s28, 4  ;;  %s2918_s25 = scalar_lea.hbm %s3889_s14, 32  ;;  %s2913_s29 = int_to_ptr.hbm [resolvable:$true] %s2912_s29 }
  0x30   : > { %2522 = vmatmul.msk.f32.vlgmr.msra.gmra.mxu0 %vm494_vm1, %v488_v4  ;;  %s2914_s26 = scalar_lea.hbm %s2913_s29, 16  ;;  %p2919_p8 = scmp.lt.s32.totalorder %s2913_s29, %s3889_s14 }
  0x31   : > { %p2915_p5 = scmp.ne.s32.totalorder %s2913_s29, %s2914_s26  ;;  %p2920_p10 = scmp.lt.s32.totalorder %s2918_s25, %s2914_s26 }
  0x33   : > { %p2916_p6 = pnand %p2915_p5, %p3097_p9  ;;  %p2921_p13 = por %p2920_p10, %p2919_p8 }
  0x35   : > { %p2917_p7 = pneg %p2916_p6 }
  0x36   : > { %2536 = vmatmul.msk.f32.gmra.mxu2 %vm674_vm0, %v669_v6 }
  0x37   : > { %p2922_p0 = pnand %p2921_p13, %p2917_p7 }
  0x38   : > { %2523 = vmatmul.msk.f32.gmra.mxu0 %vm494_vm1, %v489_v7 }
  0x3e   : > { %2541 = vmatmul.msk.f32.vlgmr.msrb.gmra.mxu2 %vm674_vm0, %v668_v2 }
  0x40   : > { %2524 = vmatmul.msk.f32.gmra.mxu0 %vm494_vm1, %v490_v33 }
  0x46   : > { %2542 = vmatmul.msk.f32.gmra.mxu2 %vm674_vm0, %v669_v6 }
  0x48   : > { %2525 = vmatmul.msk.f32.gmra.mxu0 %vm494_vm1, %v491_v35  ;;  %v2581_v35 = vld [vmem:[%s3124_s15 + $0x20] sm:$0xff] }
  0x50   : > { %2526 = vmatmul.msk.f32.gmra.mxu0 %vm494_vm1, %v492_v38 }
  0x58   : > { %2527 = vmatmul.msk.f32.gmra.mxu0 %vm494_vm1, %v493_v41 }
  0xad   : > { %v530_v8 = vpop.f32.mrf.mxu0 }
  0xae   : > { %v631_v12 = vmax.f32 %v530_v8, 0.0 }
  0xb1   : > { %v698_v9 = vpop.f32.mrf.mxu2 }
  0xb2   : > { %v704_v16 = vmax.f32 %v698_v9, 0.0 }
  0xb5   : > { %v533_v10 = vpop.f32.mrf.mxu0 }
  0xb6   : > { %v632_v11 = vmax.f32 %v533_v10, 0.0 }
  0xb8   : > { %656 = vmatpush.msra.mxu1 %v632_v11 }
  0xb9   : > { %v701_v14 = vpop.f32.mrf.mxu2 }
  0xba   : > { %657 = vmatpush.msra.mxu1 %v631_v12  ;;  %v705_v15 = vmax.f32 %v701_v14, 0.0 }
  0xbb   : > { %2532 = vmatmul.msk.f32.vlgmr.msra.gmra.mxu1 %vm494_vm1, %v628_v13 }
  0xbc   : > { %729 = vmatpush.msra.mxu3 %v705_v15 }
  0xbe   : > { %730 = vmatpush.msra.mxu3 %v704_v16 }
  0xbf   : > { %2537 = vmatmul.msk.f32.vlgmr.msra.gmra.mxu3 %vm494_vm1, %v3167_v17 }
  0xc0   : > { %848 = vmatpush.msrb.mxu3 %v2546_v18 }
  0xc1   : > { %v778_v20 = vpop.f32.mrf.mxu2 }
  0xc2   : > { %920 = vmatpush.msra.mxu3 %v2552_v21  ;;  %v784_v26 = vmax.f32 %v778_v20, 0.0  ;;  %v2575_v20 = vld [vmem:[%s3124_s15 + $0x18] sm:$0xff] }
  0xc3   : > { %2533 = vmatmul.msk.f32.gmra.mxu1 %vm494_vm1, %v629_v19 }
  0xc7   : > { %2538 = vmatmul.msk.f32.gmra.mxu3 %vm494_vm1, %v3180_v22 }
  0xc9   : > { %v781_v24 = vpop.f32.mrf.mxu2 }
  0xca   : > { %v785_v25 = vmax.f32 %v781_v24, 0.0 }
  0xcb   : > { %2534 = vmatmul.msk.f32.gmra.mxu1 %vm494_vm1, %v630_v23 }
  0xcc   : > { %800 = vmatpush.msrb.mxu1 %v785_v25 }
  0xce   : > { %801 = vmatpush.msrb.mxu1 %v784_v26  ;;  %v3295_v26 = vld [vmem:[%s3856_s8] sm:$0xff] }
  0xcf   : > { %2539 = vmatmul.msk.f32.gmra.mxu3 %vm494_vm1, %v3191_v27 }
  0xd0   : > { %1022 = vmatpush.msra.mxu1 %v1000_v28 }
  0xd3   : > { %2543 = vmatmul.msk.f32.vlgmr.msrb.gmra.mxu1 %vm494_vm1, %v3167_v17 }
  0xd7   : > { %2547 = vmatmul.msk.f32.vlgmr.msrb.gmra.mxu3 %vm674_vm0, %v668_v2 }
  0xd8   : > { %1105 = vmatpush.msrb.mxu3 %v2563_v29 }
  0xdb   : > { %2544 = vmatmul.msk.f32.gmra.mxu1 %vm494_vm1, %v3180_v22 }
  0xdf   : > { %2548 = vmatmul.msk.f32.gmra.mxu3 %vm674_vm0, %v669_v6 }
  0xe3   : > { %2545 = vmatmul.msk.f32.gmra.mxu1 %vm494_vm1, %v3191_v27 }
  0xe7   : > { %2553 = vmatmul.msk.f32.vlgmr.msra.gmra.mxu3 %vm674_vm0, %v668_v2 }
  0xe8   : > { %2672 = vmatpush.msra.mxu3 %v2569_v63 }
  0xeb   : > { %2558 = vmatmul.msk.f32.vlgmr.msra.gmra.mxu1 %vm674_vm0, %v3209_v30 }
  0xef   : > { %2554 = vmatmul.msk.f32.gmra.mxu3 %vm674_vm0, %v669_v6 }
  0xf3   : > { %2559 = vmatmul.msk.f32.gmra.mxu1 %vm674_vm0, %v3217_v31 }
  0xf7   : > { %2564 = vmatmul.msk.f32.vlgmr.msrb.gmra.mxu3 %vm674_vm0, %v3209_v30 }
  0xff   : > { %2565 = vmatmul.msk.f32.gmra.mxu3 %vm674_vm0, %v3217_v31 }
 0x107   : > { %2571 = vmatmul.msk.f32.vlgmr.msra.gmra.mxu3 %vm674_vm0, %v3217_v31 }
 0x138   : > { %v3225_v32 = vpop.f32.mrf.mxu1 }
 0x140   : > { %v3231_v34 = vpop.f32.mrf.mxu1 }
 0x142   : > { %v3237_v36 = vpop.f32.mrf.mxu3 }
 0x148   : > { %v3239_v37 = vpop.f32.mrf.mxu1 }
 0x14a   : > { %v735_v39 = vpop.f32.mrf.mxu3 }
 0x150   : > { %v3245_v40 = vpop.f32.mrf.mxu1 }
 0x152   : > { %v738_v42 = vpop.f32.mrf.mxu3 }
 0x153   : > { %v741_v43 = vadd.f32 %v738_v42, %v3239_v37 }
 0x155   : > { %v742_v44 = vmax.f32 %v741_v43, 0.0 }
 0x157   : > { %v743_v45 = vmax.f32 %v742_v44, 0.0 }
 0x158   : > { %v806_v46 = vpop.f32.mrf.mxu1 }
 0x159   : > { %v744_v47 = vsub.f32 0.0, %v743_v45  ;;  %v747_v48 = vsub.f32 %v742_v44, %v743_v45 }
 0x15a   : > { %v850_v49 = vpop.f32.mrf.mxu3 }
 0x15b   : > { %v745_v50 = vmul.f32 1.442695, %v744_v47  ;;  %v748_v51 = vmul.f32 1.442695, %v747_v48  ;;  %v856_v57 = vmax.f32 %v850_v49, 0.0 }
 0x15d   : > { %2739 = vpow2.f32 %v745_v50 }
 0x15e   : > { %2741 = vpow2.f32 %v748_v51 }
 0x160   : > { %v809_v52 = vpop.f32.mrf.mxu1 }
 0x161   : > { %v812_v53 = vadd.f32 %v809_v52, %v3239_v37 }
 0x162   : > { %v853_v54 = vpop.f32.mrf.mxu3 }
 0x163   : > { %v813_v55 = vmax.f32 %v812_v53, 0.0  ;;  %v857_v56 = vmax.f32 %v853_v54, 0.0  ;;  %v3255_v59 = vpop.eup %2739 }
 0x164   : > { %v3257_v60 = vpop.eup %2741  ;;  %v752_v3 = vperm.slane %v3255_v59, 0  ;;  %v750_v52 = vmul.f32 0.0, %v3255_v59 }
 0x165   : > { %v3253_v58 = vmax.f32 %v743_v45, %v813_v55  ;;  %872 = vmatpush.msra.mxu2 %v857_v56  ;;  %v754_v4 = vperm.slane %v3257_v60, 0 }
 0x166   : > { %v3268_v6 = vmul.f32 0.0, %v752_v3 }
 0x167   : > { %v815_v61 = vsub.f32 %v743_v45, %v3253_v58  ;;  %v818_v62 = vsub.f32 %v813_v55, %v3253_v58  ;;  %873 = vmatpush.msra.mxu2 %v856_v57  ;;  %v756_v7 = vmul.f32 %v754_v4, %v735_v39  ;;  %v755_v55 = vmul.f32 %v754_v4, %v3237_v36 }
 0x168   : > { %2549 = vmatmul.msk.f32.vlgmr.msra.gmra.mxu2 %vm494_vm1, %v3167_v17  ;;  %v1024_v0 = vpop.f32.mrf.mxu1 }
 0x169   : > { %v816_v1 = vmul.f32 1.442695, %v815_v61  ;;  %v819_v2 = vmul.f32 1.442695, %v818_v62  ;;  %v1030_v10 = vmax.f32 %v1024_v0, 0.0  ;;  %v758_v13 = vadd.f32 %v756_v7, %v3268_v6 }
 0x16a   : > { %v922_v5 = vpop.f32.mrf.mxu3  ;;  %v751_v62 = vadd.f32 %v3257_v60, %v750_v52  ;;  %v757_v59 = vadd.f32 %v755_v55, %v3268_v6 }
 0x16b   : > { %2743 = vpow2.f32 %v816_v1  ;;  %v928_v18 = vmax.f32 %v922_v5, 0.0 }
 0x16c   : > { %2745 = vpow2.f32 %v819_v2 }
 0x170   : > { %2550 = vmatmul.msk.f32.gmra.mxu2 %vm494_vm1, %v3180_v22  ;;  %v1027_v8 = vpop.f32.mrf.mxu1 }
 0x171   : > { %v3274_v9 = vpop.eup %2743  ;;  %v1031_v11 = vmax.f32 %v1027_v8, 0.0 }
 0x172   : > { %v3276_v12 = vpop.eup %2745  ;;  %v823_v14 = vperm.slane %v3274_v9, 0  ;;  %v925_v15 = vpop.f32.mrf.mxu3 }
 0x173   : > { %v826_v16 = vperm.slane %v3276_v12, 0  ;;  %v929_v19 = vmax.f32 %v925_v15, 0.0  ;;  %1055 = vmatpush.msrb.mxu2 %v1031_v11 }
 0x174   : > { %v825_v21 = vmul.f32 %v823_v14, %v758_v13  ;;  %v824_v36 = vmul.f32 %v823_v14, %v757_v59 }
 0x175   : > { %v828_v23 = vmul.f32 %v826_v16, %v806_v46  ;;  %944 = vmatpush.msrb.mxu0 %v929_v19  ;;  %1056 = vmatpush.msrb.mxu2 %v1030_v10  ;;  %v827_v3 = vmul.f32 %v826_v16, %v3245_v40 }
 0x177   : > { %1249 = vmatpush.msra.mxu2 %v2575_v20  ;;  %v3286_v24 = vadd.f32 %v828_v23, %v825_v21  ;;  %945 = vmatpush.msrb.mxu0 %v928_v18  ;;  %v829_v11 = vadd.f32 %v827_v3, %v824_v36  ;;  %v2587_v23 = vld [vmem:[%s3124_s15 + $0x28] sm:$0xff] }
 0x178   : > { %2551 = vmatmul.msk.f32.gmra.mxu2 %vm494_vm1, %v3191_v27  ;;  %2555 = vmatmul.msk.f32.vlgmr.msrb.gmra.mxu0 %vm494_vm1, %v3167_v17  ;;  %v3304_v17 = vld [vmem:[%s3856_s8 + $0x8] sm:$0xff] }
 0x179   : > { %1177 = vmatpush.msra.mxu0 %v2569_v63 }
 0x17a   : > { %v1107_v25 = vpop.f32.mrf.mxu3 }
 0x17b   : > { %v1113_v29 = vmax.f32 %v1107_v25, 0.0 }
 0x180   : > { %2556 = vmatmul.msk.f32.gmra.mxu0 %vm494_vm1, %v3180_v22  ;;  %2560 = vmatmul.msk.f32.vlgmr.msrb.gmra.mxu2 %vm494_vm1, %v3295_v26  ;;  %v3316_v22 = vld [vmem:[%s3856_s8 + $0x10] sm:$0x1] }
 0x182   : > { %v1110_v28 = vpop.f32.mrf.mxu3 }
 0x183   : > { %v1114_v33 = vmax.f32 %v1110_v28, 0.0 }
 0x185   : > { %1129 = vmatpush.msrb.mxu1 %v1114_v33 }
 0x187   : > { %1130 = vmatpush.msrb.mxu1 %v1113_v29  ;;  %v3376_v29 = vrot.slane %v3239_v37, 1 }
 0x188   : > { %2557 = vmatmul.msk.f32.gmra.mxu0 %vm494_vm1, %v3191_v27  ;;  %2561 = vmatmul.msk.f32.gmra.mxu2 %vm494_vm1, %v3304_v17  ;;  %v3334_v27 = vpop.f32.mrf.mxu0 }
 0x189   : > { %2566 = vmatmul.msk.f32.vlgmr.msrb.gmra.mxu1 %vm494_vm1, %v3295_v26 }
 0x18a   : > { %1321 = vmatpush.msra.mxu1 %v2581_v35  ;;  %v1182_v43 = vpop.f32.mrf.mxu3 }
 0x18b   : > { %v1186_v44 = vmax.f32 %v1182_v43, 0.0 }
 0x18d   : > { %1201 = vmatpush.msrb.mxu3 %v1186_v44 }
 0x190   : > { %2562 = vmatmul.msk.f32.gmra.mxu2 %vm494_vm1, %v3316_v22  ;;  %2570 = vmatmul.msk.f32.vlgmr.msra.gmra.mxu0 %vm674_vm0, %v3209_v30  ;;  %v3336_v38 = vpop.f32.mrf.mxu0 }
 0x191   : > { %2567 = vmatmul.msk.f32.gmra.mxu1 %vm494_vm1, %v3304_v17 }
 0x198   : > { %2576 = vmatmul.msk.f32.vlgmr.msra.gmra.mxu2 %vm674_vm0, %v3209_v30  ;;  %v3338_v39 = vpop.f32.mrf.mxu0 }
 0x199   : > { %2568 = vmatmul.msk.f32.gmra.mxu1 %vm494_vm1, %v3316_v22 }
 0x1a0   : > { %2577 = vmatmul.msk.f32.gmra.mxu2 %vm674_vm0, %v3217_v31  ;;  %v3340_v42 = vpop.f32.mrf.mxu0 }
 0x1a1   : > { %2582 = vmatmul.msk.f32.vlgmr.msra.gmra.mxu1 %vm674_vm0, %v3209_v30 }
 0x1a9   : > { %2583 = vmatmul.msk.f32.gmra.mxu1 %vm674_vm0, %v3217_v31 }
 0x1eb   : > { %v875_v41 = vpop.f32.mrf.mxu2 }
 0x1f3   : > { %v878_v45 = vpop.f32.mrf.mxu2 }
 0x1f5   : > { %v3342_v46 = vpop.f32.mrf.mxu0 }
 0x1fb   : > { %v881_v47 = vpop.f32.mrf.mxu2 }
 0x1fc   : > { %v884_v48 = vadd.f32 %v881_v47, %v3239_v37 }
 0x1fd   : > { %v3345_v49 = vpop.f32.mrf.mxu0 }
 0x1fe   : > { %v885_v50 = vmax.f32 %v884_v48, 0.0 }
 0x200   : > { %v886_v51 = vmax.f32 %v3253_v58, %v885_v50 }
 0x202   : > { %v887_v53 = vsub.f32 %v3253_v58, %v886_v51  ;;  %v890_v54 = vsub.f32 %v885_v50, %v886_v51  ;;  %v821_v58 = vmul.f32 %v3274_v9, %v751_v62 }
 0x203   : > { %v3353_v56 = vpop.f32.mrf.mxu2 }
 0x204   : > { %v888_v57 = vmul.f32 1.442695, %v887_v53  ;;  %v891_v61 = vmul.f32 1.442695, %v890_v54  ;;  %v822_v4 = vadd.f32 %v3276_v12, %v821_v58 }
 0x205   : > { %v953_v63 = vpop.f32.mrf.mxu0 }
 0x206   : > { %2747 = vpow2.f32 %v888_v57  ;;  %v956_v0 = vadd.f32 %v953_v63, %v3239_v37  ;;  %v3357_v1 = vpop.f32.mrf.mxu1 }
 0x207   : > { %2749 = vpow2.f32 %v891_v61 }
 0x208   : > { %v957_v2 = vmax.f32 %v956_v0, 0.0 }
 0x20a   : > { %v958_v60 = vmax.f32 %v886_v51, %v957_v2 }
 0x20b   : > { %v3367_v5 = vpop.f32.mrf.mxu2 }
 0x20c   : > { %v2748_v7 = vpop.eup %2747  ;;  %v959_v8 = vsub.f32 %v886_v51, %v958_v60  ;;  %v962_v6 = vsub.f32 %v957_v2, %v958_v60 }
 0x20d   : > { %v2750_v10 = vpop.eup %2749  ;;  %v893_v13 = vmul.f32 %v2748_v7, %v822_v4  ;;  %v895_v15 = vperm.slane %v2748_v7, 0  ;;  %v1179_v18 = vpop.f32.mrf.mxu0 }
 0x20e   : > { %v898_v9 = vperm.slane %v2750_v10, 0  ;;  %v960_v14 = vmul.f32 1.442695, %v959_v8  ;;  %v963_v19 = vmul.f32 1.442695, %v962_v6  ;;  %v3369_v20 = vpop.f32.mrf.mxu1  ;;  %v1185_v40 = vmax.f32 %v1179_v18, 0.0 }
 0x20f   : > { %v894_v16 = vadd.f32 %v2750_v10, %v893_v13  ;;  %v896_v21 = vmul.f32 %v895_v15, %v829_v11  ;;  %v897_v12 = vmul.f32 %v895_v15, %v3286_v24 }
 0x210   : > { %v899_v25 = vmul.f32 %v898_v9, %v875_v41  ;;  %v900_v28 = vmul.f32 %v898_v9, %v878_v45  ;;  %2751 = vpow2.f32 %v960_v14  ;;  %1202 = vmatpush.msrb.mxu3 %v1185_v40 }
 0x211   : > { %2753 = vpow2.f32 %v963_v19  ;;  %2572 = vmatmul.msk.f32.vlgmr.msrb.gmra.mxu3 %vm494_vm1, %v3295_v26 }
 0x212   : > { %v901_v33 = vadd.f32 %v899_v25, %v896_v21  ;;  %v902_v35 = vadd.f32 %v900_v28, %v897_v12  ;;  %1393 = vmatpush.msra.mxu3 %v2587_v23 }
 0x213   : > { %v1064_v43 = vpop.f32.mrf.mxu2 }
 0x214   : > { %v1070_v44 = vadd.f32 %v3376_v29, %v1064_v43 }
 0x216   : > { %v2752_v47 = vpop.eup %2751  ;;  %v1071_v24 = vmax.f32 %v1070_v44, 0.0  ;;  %v1138_v48 = vpop.f32.mrf.mxu1 }
 0x217   : > { %v2754_v41 = vpop.eup %2753  ;;  %v965_v45 = vmul.f32 %v2752_v47, %v894_v16  ;;  %v967_v50 = vperm.slane %v2752_v47, 0  ;;  %v1141_v51 = vadd.f32 %v1138_v48, %v3376_v29  ;;  %v2593_v48 = vld [vmem:[%s3124_s15 + $0x30] sm:$0xff] }
 0x218   : > { %v970_v52 = vperm.slane %v2754_v41, 0  ;;  %v1072_v53 = vmax.f32 %v1071_v24, 0.0 }
 0x219   : > { %v966_v54 = vadd.f32 %v2754_v41, %v965_v45  ;;  %v968_v55 = vmul.f32 %v967_v50, %v901_v33  ;;  %v969_v37 = vmul.f32 %v967_v50, %v902_v35  ;;  %v1142_v57 = vmax.f32 %v1141_v51, 0.0  ;;  %2573 = vmatmul.msk.f32.gmra.mxu3 %vm494_vm1, %v3304_v17 }
 0x21a   : > { %v971_v61 = vmul.f32 %v970_v52, %v3342_v46  ;;  %v972_v62 = vmul.f32 %v970_v52, %v3345_v49  ;;  %v1073_v63 = vsub.f32 0.0, %v1072_v53  ;;  %v1076_v0 = vsub.f32 %v1071_v24, %v1072_v53 }
 0x21b   : > { %2755 = vrcp.f32 %v966_v54  ;;  %v1251_v59 = vpop.f32.mrf.mxu2  ;;  %v3388_v60 = vmax.f32 %v1072_v53, %v1142_v57  ;;  %v984_v14 = vand.u32 2147483647, %v966_v54  ;;  %v986_v19 = vand.u32 2147483648, %v966_v54 }
 0x21c   : > { %v3384_v58 = vadd.f32 %v971_v61, %v968_v55  ;;  %v3386_v2 = vadd.f32 %v972_v62, %v969_v37  ;;  %v1074_v36 = vmul.f32 1.442695, %v1073_v63  ;;  %v1077_v3 = vmul.f32 1.442695, %v1076_v0 }
 0x21d   : > { %v1144_v7 = vsub.f32 %v1072_v53, %v3388_v60  ;;  %v1147_v46 = vsub.f32 %v1142_v57, %v3388_v60  ;;  %v1257_v23 = vmax.f32 %v1251_v59, 0.0  ;;  %vm980_vm3 = vweird.f32 %v966_v54 }
 0x21e   : > { %2757 = vpow2.f32 %v1074_v36  ;;  %v1323_v4 = vpop.f32.mrf.mxu1  ;;  %vm985_vm5 = vcmp.eq.f32.partialorder %v984_v14, 8.507059e+37  ;;  %v987_v45 = vor.u32 1.1754944e-38, %v986_v19 }
 0x21f   : > { %2759 = vpow2.f32 %v1077_v3  ;;  %v1145_v8 = vmul.f32 1.442695, %v1144_v7  ;;  %v1148_v6 = vmul.f32 1.442695, %v1147_v46  ;;  %v1329_v35 = vmax.f32 %v1323_v4, 0.0 }
 0x221   : > { %v2756_v49 = vpop.eup %2755  ;;  %2574 = vmatmul.msk.f32.gmra.mxu3 %vm494_vm1, %v3316_v22  ;;  %2761 = vpow2.f32 %v1145_v8 }
 0x222   : > { %v976_v10 = vmul.f32 %v2756_v49, %v966_v54  ;;  %2763 = vpow2.f32 %v1148_v6  ;;  %vm981_vm2 = vweird.f32 %v2756_v49 }
 0x223   : > { %v1254_v11 = vpop.f32.mrf.mxu2  ;;  %vm982_vm4 = vmor %vm980_vm3, %vm981_vm2 }
 0x224   : > { %v2758_v13 = vpop.eup %2757  ;;  %v977_v15 = vsub.f32 1.0, %v976_v10  ;;  %v1258_v18 = vmax.f32 %v1254_v11, 0.0 }
 0x225   : > { %v2760_v9 = vpop.eup %2759  ;;  %v1079_v40 = vmul.f32 0.0, %v2758_v13  ;;  %v1081_v16 = vperm.slane %v2758_v13, 0 }
 0x226   : > { %v978_v21 = vmul.f32 %v2756_v49, %v977_v15  ;;  %v1083_v12 = vperm.slane %v2760_v9, 0  ;;  %v1326_v25 = vpop.f32.mrf.mxu1  ;;  %1273 = vmatpush.msrb.mxu0 %v1258_v18 }
 0x227   : > { %v1080_v28 = vadd.f32 %v2760_v9, %v1079_v40  ;;  %v1082_v33 = vmul.f32 0.0, %v1081_v16  ;;  %v1330_v43 = vmax.f32 %v1326_v25, 0.0  ;;  %v2762_v41 = vpop.eup %2761 }
 0x228   : > { %v979_v44 = vadd.f32 %v2756_v49, %v978_v21  ;;  %v1084_v47 = vmul.f32 %v1083_v12, %v3353_v56  ;;  %v1085_v24 = vmul.f32 %v1083_v12, %v3367_v5  ;;  %1274 = vmatpush.msrb.mxu0 %v1257_v23  ;;  %v2764_v50 = vpop.eup %2763  ;;  %v2599_v56 = vld [vmem:[%s3124_s15 + $0x38] sm:$0xff]  ;;  %v1152_v55 = vperm.slane %v2762_v41, 0 }
 0x229   : > { %1345 = vmatpush.msrb.mxu2 %v1330_v43  ;;  %2578 = vmatmul.msk.f32.vlgmr.msrb.gmra.mxu0 %vm494_vm1, %v3295_v26  ;;  %v1150_v54 = vmul.f32 %v2762_v41, %v1080_v28  ;;  %v1155_v37 = vperm.slane %v2764_v50, 0  ;;  %v2605_v41 = vld [vmem:[%s3124_s15 + $0x40] sm:$0xff] }
 0x22a   : > { %v983_v51 = vsel %vm982_vm4, %v2756_v49, %v979_v44  ;;  %v1086_v52 = vadd.f32 %v1084_v47, %v1082_v33  ;;  %v1087_v53 = vadd.f32 %v1085_v24, %v1082_v33  ;;  %2588 = vmatmul.msk.f32.vlgmr.msra.gmra.mxu3 %vm674_vm0, %v3209_v30  ;;  %1465 = vmatpush.msra.mxu0 %v2593_v48 }
 0x22b   : > { %v988_v5 = vsel %vm985_vm5, %v987_v45, %v983_v51  ;;  %1346 = vmatpush.msrb.mxu2 %v1329_v35  ;;  %v1151_v61 = vadd.f32 %v2764_v50, %v1150_v54  ;;  %v1156_v0 = vmul.f32 %v1155_v37, %v3357_v1  ;;  %v1157_v59 = vmul.f32 %v1155_v37, %v3369_v20 }
 0x22c   : > { %v990_v57 = vperm.slane %v988_v5, 0  ;;  %2584 = vmatmul.msk.f32.vlgmr.msrb.gmra.mxu2 %vm494_vm1, %v3295_v26  ;;  %v1153_v62 = vmul.f32 %v1152_v55, %v1086_v52  ;;  %v1154_v63 = vmul.f32 %v1152_v55, %v1087_v53 }
 0x22d   : > { %1537 = vmatpush.msra.mxu2 %v2599_v56 }
 0x22e   : > { %v3408_v36 = vmul.f32 %v990_v57, %v3384_v58  ;;  %v3411_v3 = vmul.f32 %v990_v57, %v3386_v2  ;;  %v1158_v4 = vadd.f32 %v1156_v0, %v1153_v62  ;;  %v1159_v7 = vadd.f32 %v1157_v59, %v1154_v63 }
 0x231   : > { %2579 = vmatmul.msk.f32.gmra.mxu0 %vm494_vm1, %v3304_v17 }
 0x232   : > { %2589 = vmatmul.msk.f32.gmra.mxu3 %vm674_vm0, %v3217_v31 }
 0x234   : > { %2585 = vmatmul.msk.f32.gmra.mxu2 %vm494_vm1, %v3304_v17 }
 0x239   : > { %2580 = vmatmul.msk.f32.gmra.mxu0 %vm494_vm1, %v3316_v22 }
 0x23c   : > { %2586 = vmatmul.msk.f32.gmra.mxu2 %vm494_vm1, %v3316_v22 }
 0x241   : > { %2594 = vmatmul.msk.f32.vlgmr.msra.gmra.mxu0 %vm674_vm0, %v3209_v30 }
 0x244   : > { %2600 = vmatmul.msk.f32.vlgmr.msra.gmra.mxu2 %vm674_vm0, %v3209_v30 }
 0x249   : > { %2595 = vmatmul.msk.f32.gmra.mxu0 %vm674_vm0, %v3217_v31 }
 0x24c   : > { %2601 = vmatmul.msk.f32.gmra.mxu2 %vm674_vm0, %v3217_v31 }
 0x294   : > { %v1204_v1 = vpop.f32.mrf.mxu3 }
 0x29c   : > { %v1207_v20 = vpop.f32.mrf.mxu3 }
 0x2a4   : > { %v1210_v58 = vpop.f32.mrf.mxu3 }
 0x2a5   : > { %v1213_v2 = vadd.f32 %v1210_v58, %v3376_v29 }
 0x2a6   : > { %v3432_v46 = vpop.f32.mrf.mxu0 }
 0x2a7   : > { %v1214_v49 = vmax.f32 %v1213_v2, 0.0 }
 0x2a9   : > { %v1215_v8 = vmax.f32 %v3388_v60, %v1214_v49 }
 0x2ab   : > { %v1216_v6 = vsub.f32 %v3388_v60, %v1215_v8  ;;  %v1219_v10 = vsub.f32 %v1214_v49, %v1215_v8 }
 0x2ad   : > { %v1217_v11 = vmul.f32 1.442695, %v1216_v6  ;;  %v1220_v13 = vmul.f32 1.442695, %v1219_v10  ;;  %v1395_v15 = vpop.f32.mrf.mxu3 }
 0x2ae   : > { %v1279_v18 = vpop.f32.mrf.mxu0  ;;  %v1401_v12 = vmax.f32 %v1395_v15, 0.0  ;;  %v2611_v15 = vld [vmem:[%s3124_s15 + $0x48] sm:$0xff] }
 0x2af   : > { %2765 = vpow2.f32 %v1217_v11  ;;  %v3436_v9 = vpop.f32.mrf.mxu2 }
 0x2b0   : > { %2767 = vpow2.f32 %v1220_v13 }
 0x2b5   : > { %v2766_v14 = vpop.eup %2765  ;;  %v1398_v19 = vpop.f32.mrf.mxu3 }
 0x2b6   : > { %v2768_v40 = vpop.eup %2767  ;;  %v1222_v16 = vmul.f32 %v2766_v14, %v1151_v61  ;;  %v1224_v21 = vperm.slane %v2766_v14, 0  ;;  %v1402_v23 = vmax.f32 %v1398_v19, 0.0  ;;  %v1282_v25 = vpop.f32.mrf.mxu0 }
 0x2b7   : > { %v1227_v28 = vperm.slane %v2768_v40, 0  ;;  %v1285_v60 = vadd.f32 %v1282_v25, %v3376_v29  ;;  %v3439_v33 = vpop.f32.mrf.mxu2 }
 0x2b8   : > { %v1223_v35 = vadd.f32 %v2768_v40, %v1222_v16  ;;  %v1225_v43 = vmul.f32 %v1224_v21, %v1158_v4  ;;  %v1226_v44 = vmul.f32 %v1224_v21, %v1159_v7  ;;  %1417 = vmatpush.msrb.mxu1 %v1402_v23 }
 0x2b9   : > { %v1228_v47 = vmul.f32 %v1227_v28, %v1204_v1  ;;  %v1229_v24 = vmul.f32 %v1227_v28, %v1207_v20  ;;  %v1286_v48 = vmax.f32 %v1285_v60, 0.0 }
 0x2ba   : > { %1418 = vmatpush.msrb.mxu1 %v1401_v12 }
 0x2bb   : > { %v1230_v45 = vadd.f32 %v1228_v47, %v1225_v43  ;;  %v1231_v50 = vadd.f32 %v1229_v24, %v1226_v44  ;;  %v1287_v51 = vmax.f32 %v1215_v8, %v1286_v48  ;;  %2590 = vmatmul.msk.f32.vlgmr.msrb.gmra.mxu1 %vm494_vm1, %v3295_v26  ;;  %v2617_v47 = vld [vmem:[%s3124_s15 + $0x50] sm:$0xff] }
 0x2bc   : > { %1609 = vmatpush.msra.mxu1 %v2605_v41 }
 0x2bd   : > { %v1288_v52 = vsub.f32 %v1215_v8, %v1287_v51  ;;  %v1291_v53 = vsub.f32 %v1286_v48, %v1287_v51 }
 0x2be   : > { %v1467_v54 = vpop.f32.mrf.mxu0 }
 0x2bf   : > { %v1289_v56 = vmul.f32 1.442695, %v1288_v52  ;;  %v1292_v5 = vmul.f32 1.442695, %v1291_v53  ;;  %v1354_v55 = vpop.f32.mrf.mxu2  ;;  %v1473_v6 = vmax.f32 %v1467_v54, 0.0 }
 0x2c0   : > { %v1357_v37 = vadd.f32 %v1354_v55, %v3376_v29 }
 0x2c1   : > { %2769 = vpow2.f32 %v1289_v56 }
 0x2c2   : > { %2771 = vpow2.f32 %v1292_v5  ;;  %v1358_v57 = vmax.f32 %v1357_v37, 0.0 }
 0x2c3   : > { %2591 = vmatmul.msk.f32.gmra.mxu1 %vm494_vm1, %v3304_v17 }
 0x2c4   : > { %v3447_v61 = vmax.f32 %v1287_v51, %v1358_v57 }
 0x2c6   : > { %v1360_v62 = vsub.f32 %v1287_v51, %v3447_v61  ;;  %v1363_v63 = vsub.f32 %v1358_v57, %v3447_v61  ;;  %v1470_v0 = vpop.f32.mrf.mxu0 }
 0x2c7   : > { %v2770_v59 = vpop.eup %2769  ;;  %v1474_v4 = vmax.f32 %v1470_v0, 0.0  ;;  %v1539_v7 = vpop.f32.mrf.mxu2 }
 0x2c8   : > { %v2772_v1 = vpop.eup %2771  ;;  %v1294_v20 = vmul.f32 %v2770_v59, %v1223_v35  ;;  %v1296_v58 = vperm.slane %v2770_v59, 0  ;;  %v1361_v2 = vmul.f32 1.442695, %v1360_v62  ;;  %v1364_v49 = vmul.f32 1.442695, %v1363_v63 }
 0x2c9   : > { %v1299_v8 = vperm.slane %v2772_v1, 0  ;;  %1489 = vmatpush.msrb.mxu3 %v1474_v4  ;;  %v1545_v23 = vmax.f32 %v1539_v7, 0.0 }
 0x2ca   : > { %v1295_v10 = vadd.f32 %v2772_v1, %v1294_v20  ;;  %v1297_v11 = vmul.f32 %v1296_v58, %v1230_v45  ;;  %v1298_v13 = vmul.f32 %v1296_v58, %v1231_v50  ;;  %2773 = vpow2.f32 %v1361_v2 }
 0x2cb   : > { %v1300_v14 = vmul.f32 %v1299_v8, %v3432_v46  ;;  %v1301_v19 = vmul.f32 %v1299_v8, %v1279_v18  ;;  %2775 = vpow2.f32 %v1364_v49  ;;  %2592 = vmatmul.msk.f32.gmra.mxu1 %vm494_vm1, %v3316_v22  ;;  %1490 = vmatpush.msrb.mxu3 %v1473_v6 }
 0x2cc   : > { %2596 = vmatmul.msk.f32.vlgmr.msrb.gmra.mxu3 %vm494_vm1, %v3295_v26 }
 0x2cd   : > { %v1302_v40 = vadd.f32 %v1300_v14, %v1297_v11  ;;  %v1303_v16 = vadd.f32 %v1301_v19, %v1298_v13  ;;  %1681 = vmatpush.msra.mxu3 %v2611_v15 }
 0x2cf   : > { %v1542_v21 = vpop.f32.mrf.mxu2 }
 0x2d0   : > { %v2774_v12 = vpop.eup %2773  ;;  %v1546_v25 = vmax.f32 %v1542_v21, 0.0 }
 0x2d1   : > { %v2776_v28 = vpop.eup %2775  ;;  %v1366_v60 = vmul.f32 %v2774_v12, %v1295_v10  ;;  %v1368_v46 = vperm.slane %v2774_v12, 0  ;;  %v2623_v10 = vld [vmem:[%s3124_s15 + $0x58] sm:$0xff] }
 0x2d2   : > { %v1371_v18 = vperm.slane %v2776_v28, 0  ;;  %1561 = vmatpush.msrb.mxu0 %v1546_v25 }
 0x2d3   : > { %v1367_v35 = vadd.f32 %v2776_v28, %v1366_v60  ;;  %v1369_v43 = vmul.f32 %v1368_v46, %v1302_v40  ;;  %v1370_v44 = vmul.f32 %v1368_v46, %v1303_v16  ;;  %2606 = vmatmul.msk.f32.vlgmr.msra.gmra.mxu1 %vm674_vm0, %v3209_v30 }
 0x2d4   : > { %v1372_v24 = vmul.f32 %v1371_v18, %v3436_v9  ;;  %v1373_v48 = vmul.f32 %v1371_v18, %v3439_v33  ;;  %1562 = vmatpush.msrb.mxu0 %v1545_v23  ;;  %2597 = vmatmul.msk.f32.gmra.mxu3 %vm494_vm1, %v3304_v17 }
 0x2d5   : > { %2602 = vmatmul.msk.f32.vlgmr.msrb.gmra.mxu0 %vm494_vm1, %v3295_v26 }
 0x2d6   : > { %v1374_v41 = vadd.f32 %v1372_v24, %v1369_v43  ;;  %v1375_v45 = vadd.f32 %v1373_v48, %v1370_v44  ;;  %1753 = vmatpush.msra.mxu0 %v2617_v47 }
 0x2db   : > { %2607 = vmatmul.msk.f32.gmra.mxu1 %vm674_vm0, %v3217_v31 }
 0x2dc   : > { %2598 = vmatmul.msk.f32.gmra.mxu3 %vm494_vm1, %v3316_v22 }
 0x2dd   : > { %2603 = vmatmul.msk.f32.gmra.mxu0 %vm494_vm1, %v3304_v17 }
 0x2e4   : > { %2612 = vmatmul.msk.f32.vlgmr.msra.gmra.mxu3 %vm674_vm0, %v3209_v30 }
 0x2e5   : > { %2604 = vmatmul.msk.f32.gmra.mxu0 %vm494_vm1, %v3316_v22 }
 0x2ec   : > { %2613 = vmatmul.msk.f32.gmra.mxu3 %vm674_vm0, %v3217_v31 }
 0x2ed   : > { %2618 = vmatmul.msk.f32.vlgmr.msra.gmra.mxu0 %vm674_vm0, %v3209_v30 }
 0x2f5   : > { %2619 = vmatmul.msk.f32.gmra.mxu0 %vm674_vm0, %v3217_v31 }
 0x338   : > { %v1420_v9 = vpop.f32.mrf.mxu1 }
 0x340   : > { %v1423_v33 = vpop.f32.mrf.mxu1 }
 0x348   : > { %v1426_v50 = vpop.f32.mrf.mxu1 }
 0x349   : > { %v1429_v51 = vadd.f32 %v1426_v50, %v3376_v29 }
 0x34b   : > { %v1430_v52 = vmax.f32 %v1429_v51, 0.0 }
 0x34d   : > { %v1431_v53 = vmax.f32 %v3447_v61, %v1430_v52 }
 0x34f   : > { %v1432_v54 = vsub.f32 %v3447_v61, %v1431_v53  ;;  %v1435_v56 = vsub.f32 %v1430_v52, %v1431_v53  ;;  %v3485_v5 = vpop.f32.mrf.mxu3 }
 0x350   : > { %v1611_v55 = vpop.f32.mrf.mxu1 }
 0x351   : > { %v1433_v37 = vmul.f32 1.442695, %v1432_v54  ;;  %v1436_v57 = vmul.f32 1.442695, %v1435_v56  ;;  %v1617_v4 = vmax.f32 %v1611_v55, 0.0 }
 0x352   : > { %v3487_v62 = vpop.f32.mrf.mxu0 }
 0x353   : > { %2777 = vpow2.f32 %v1433_v37 }
 0x354   : > { %2779 = vpow2.f32 %v1436_v57 }
 0x357   : > { %v3489_v63 = vpop.f32.mrf.mxu3 }
 0x358   : > { %v1614_v0 = vpop.f32.mrf.mxu1 }
 0x359   : > { %v2778_v59 = vpop.eup %2777  ;;  %v1618_v7 = vmax.f32 %v1614_v0, 0.0 }
 0x35a   : > { %v2780_v1 = vpop.eup %2779  ;;  %v1438_v20 = vmul.f32 %v2778_v59, %v1367_v35  ;;  %v1440_v61 = vperm.slane %v2778_v59, 0  ;;  %v3491_v58 = vpop.f32.mrf.mxu0 }
 0x35b   : > { %v1443_v2 = vperm.slane %v2780_v1, 0  ;;  %1633 = vmatpush.msrb.mxu2 %v1618_v7  ;;  %v2629_v7 = vld [vmem:[%s3124_s15 + $0x60] sm:$0xff] }
 0x35c   : > { %v1439_v49 = vadd.f32 %v2780_v1, %v1438_v20  ;;  %v1441_v8 = vmul.f32 %v1440_v61, %v1374_v41  ;;  %v1442_v6 = vmul.f32 %v1440_v61, %v1375_v45 }
 0x35d   : > { %v1444_v11 = vmul.f32 %v1443_v2, %v1420_v9  ;;  %v1445_v13 = vmul.f32 %v1443_v2, %v1423_v33  ;;  %1634 = vmatpush.msrb.mxu2 %v1617_v4 }
 0x35e   : > { %2608 = vmatmul.msk.f32.vlgmr.msrb.gmra.mxu2 %vm494_vm1, %v3295_v26 }
 0x35f   : > { %v1446_v15 = vadd.f32 %v1444_v11, %v1441_v8  ;;  %v1447_v14 = vadd.f32 %v1445_v13, %v1442_v6  ;;  %v1498_v19 = vpop.f32.mrf.mxu3  ;;  %1825 = vmatpush.msra.mxu2 %v2623_v10  ;;  %v2635_v11 = vld [vmem:[%s3124_s15 + $0x68] sm:$0xff] }
 0x360   : > { %v1501_v40 = vadd.f32 %v1498_v19, %v3376_v29 }
 0x362   : > { %v1502_v16 = vmax.f32 %v1501_v40, 0.0  ;;  %v1570_v21 = vpop.f32.mrf.mxu0 }
 0x363   : > { %v1573_v12 = vadd.f32 %v1570_v21, %v3376_v29 }
 0x364   : > { %v1503_v23 = vmax.f32 %v1431_v53, %v1502_v16 }
 0x365   : > { %v1574_v25 = vmax.f32 %v1573_v12, 0.0 }
 0x366   : > { %v1504_v28 = vsub.f32 %v1431_v53, %v1503_v23  ;;  %v1507_v60 = vsub.f32 %v1502_v16, %v1503_v23  ;;  %2609 = vmatmul.msk.f32.gmra.mxu2 %vm494_vm1, %v3304_v17 }
 0x367   : > { %v3500_v46 = vmax.f32 %v1503_v23, %v1574_v25  ;;  %v1683_v18 = vpop.f32.mrf.mxu3 }
 0x368   : > { %v1505_v35 = vmul.f32 1.442695, %v1504_v28  ;;  %v1508_v43 = vmul.f32 1.442695, %v1507_v60  ;;  %v1689_v54 = vmax.f32 %v1683_v18, 0.0 }
 0x369   : > { %v1576_v44 = vsub.f32 %v1503_v23, %v3500_v46  ;;  %v1579_v47 = vsub.f32 %v1574_v25, %v3500_v46  ;;  %v2658_v23 = vmul.f32 -1.442695, %v3231_v34  ;;  %v2657_v28 = vmul.f32 -1.442695, %v3225_v32 }
 0x36a   : > { %2781 = vpow2.f32 %v1505_v35  ;;  %v1755_v24 = vpop.f32.mrf.mxu0 }
 0x36b   : > { %2783 = vpow2.f32 %v1508_v43  ;;  %v1577_v48 = vmul.f32 1.442695, %v1576_v44  ;;  %v1580_v41 = vmul.f32 1.442695, %v1579_v47  ;;  %v1761_v56 = vmax.f32 %v1755_v24, 0.0 }
 0x36d   : > { %2785 = vpow2.f32 %v1577_v48 }
 0x36e   : > { %2787 = vpow2.f32 %v1580_v41  ;;  %2610 = vmatmul.msk.f32.gmra.mxu2 %vm494_vm1, %v3316_v22 }
 0x36f   : > { %v1686_v45 = vpop.f32.mrf.mxu3  ;;  %2789 = vpow2.f32 %v2658_v23 }
 0x370   : > { %v2782_v9 = vpop.eup %2781  ;;  %v1690_v33 = vmax.f32 %v1686_v45, 0.0  ;;  %2791 = vpow2.f32 %v2657_v28 }
 0x371   : > { %v2784_v50 = vpop.eup %2783  ;;  %v1510_v51 = vmul.f32 %v2782_v9, %v1439_v49  ;;  %v1512_v52 = vperm.slane %v2782_v9, 0 }
 0x372   : > { %v1515_v53 = vperm.slane %v2784_v50, 0  ;;  %v1758_v55 = vpop.f32.mrf.mxu0  ;;  %1705 = vmatpush.msrb.mxu1 %v1690_v33 }
 0x373   : > { %v2786_v37 = vpop.eup %2785  ;;  %v1511_v57 = vadd.f32 %v2784_v50, %v1510_v51  ;;  %v1513_v0 = vmul.f32 %v1512_v52, %v1446_v15  ;;  %v1514_v59 = vmul.f32 %v1512_v52, %v1447_v14  ;;  %v1762_v4 = vmax.f32 %v1758_v55, 0.0 }
 0x374   : > { %v2788_v1 = vpop.eup %2787  ;;  %v1516_v20 = vmul.f32 %v1515_v53, %v3485_v5  ;;  %v1517_v61 = vmul.f32 %v1515_v53, %v3489_v63  ;;  %1706 = vmatpush.msrb.mxu1 %v1689_v54  ;;  %v1584_v10 = vperm.slane %v2786_v37, 0 }
 0x375   : > { %v1582_v2 = vmul.f32 %v2786_v37, %v1511_v57  ;;  %v1587_v49 = vperm.slane %v2788_v1, 0  ;;  %1777 = vmatpush.msrb.mxu3 %v1762_v4  ;;  %2614 = vmatmul.msk.f32.vlgmr.msrb.gmra.mxu1 %vm494_vm1, %v3295_v26  ;;  %v2790_v24 = vpop.eup %2789 }
 0x376   : > { %v1518_v8 = vadd.f32 %v1516_v20, %v1513_v0  ;;  %v1519_v6 = vadd.f32 %v1517_v61, %v1514_v59  ;;  %2624 = vmatmul.msk.f32.vlgmr.msra.gmra.mxu2 %vm674_vm0, %v3209_v30  ;;  %1897 = vmatpush.msra.mxu1 %v2629_v7  ;;  %v2792_v34 = vpop.eup %2791  ;;  %v3547_v48 = vadd.f32 1.0, %v2790_v24  ;;  %v2641_v59 = vld [vmem:[%s3124_s15 + $0x70] sm:$0xff] }
 0x377   : > { %v1583_v13 = vadd.f32 %v2788_v1, %v1582_v2  ;;  %v1588_v5 = vmul.f32 %v1587_v49, %v3487_v62  ;;  %v1589_v63 = vmul.f32 %v1587_v49, %v3491_v58  ;;  %1778 = vmatpush.msrb.mxu3 %v1761_v56  ;;  %v3549_v45 = vadd.f32 1.0, %v2792_v34 }
 0x378   : > { %v1585_v15 = vmul.f32 %v1584_v10, %v1518_v8  ;;  %v1586_v14 = vmul.f32 %v1584_v10, %v1519_v6  ;;  %2620 = vmatmul.msk.f32.vlgmr.msrb.gmra.mxu3 %vm494_vm1, %v3295_v26  ;;  %vm2292_vm6 = vweird.f32 %v3547_v48 }
 0x379   : > { %1969 = vmatpush.msra.mxu3 %v2635_v11  ;;  %vm2277_vm8 = vweird.f32 %v3549_v45 }
 0x37a   : > { %v1590_v19 = vadd.f32 %v1588_v5, %v1585_v15  ;;  %v1591_v40 = vadd.f32 %v1589_v63, %v1586_v14 }
 0x37d   : > { %2615 = vmatmul.msk.f32.gmra.mxu1 %vm494_vm1, %v3304_v17 }
 0x37e   : > { %2625 = vmatmul.msk.f32.gmra.mxu2 %vm674_vm0, %v3217_v31 }
 0x380   : > { %2621 = vmatmul.msk.f32.gmra.mxu3 %vm494_vm1, %v3304_v17 }
 0x385   : > { %2616 = vmatmul.msk.f32.gmra.mxu1 %vm494_vm1, %v3316_v22 }
 0x388   : > { %2622 = vmatmul.msk.f32.gmra.mxu3 %vm494_vm1, %v3316_v22 }
 0x38d   : > { %2630 = vmatmul.msk.f32.vlgmr.msra.gmra.mxu1 %vm674_vm0, %v3209_v30 }
 0x390   : > { %2636 = vmatmul.msk.f32.vlgmr.msra.gmra.mxu3 %vm674_vm0, %v3209_v30 }
 0x395   : > { %2631 = vmatmul.msk.f32.gmra.mxu1 %vm674_vm0, %v3217_v31 }
 0x398   : > { %2637 = vmatmul.msk.f32.gmra.mxu3 %vm674_vm0, %v3217_v31 }
 0x3e1   : > { %v1636_v62 = vpop.f32.mrf.mxu2 }
 0x3e9   : > { %v1639_v58 = vpop.f32.mrf.mxu2 }
 0x3f1   : > { %v1642_v16 = vpop.f32.mrf.mxu2 }
 0x3f2   : > { %v1645_v21 = vadd.f32 %v1642_v16, %v3376_v29  ;;  %v3537_v12 = vpop.f32.mrf.mxu1 }
 0x3f4   : > { %v1646_v25 = vmax.f32 %v1645_v21, 0.0 }
 0x3f6   : > { %v1647_v30 = vmax.f32 %v3500_v46, %v1646_v25 }
 0x3f8   : > { %v1648_v60 = vsub.f32 %v3500_v46, %v1647_v30  ;;  %v1651_v18 = vsub.f32 %v1646_v25, %v1647_v30 }
 0x3f9   : > { %v1827_v31 = vpop.f32.mrf.mxu2 }
 0x3fa   : > { %v1649_v35 = vmul.f32 1.442695, %v1648_v60  ;;  %v1652_v43 = vmul.f32 1.442695, %v1651_v18  ;;  %v3543_v44 = vpop.f32.mrf.mxu1  ;;  %v1833_v46 = vmax.f32 %v1827_v31, 0.0 }
 0x3fb   : > { %v3545_v47 = vpop.f32.mrf.mxu3 }
 0x3fc   : > { %2793 = vpow2.f32 %v1649_v35 }
 0x3fd   : > { %2795 = vpow2.f32 %v1652_v43 }
 0x3fe   : > { %2797 = vrcp.f32 %v3547_v48 }
 0x3ff   : > { %2799 = vrcp.f32 %v3549_v45 }
 0x401   : > { %v1830_v32 = vpop.f32.mrf.mxu2 }
 0x402   : > { %v2794_v41 = vpop.eup %2793  ;;  %v1834_v9 = vmax.f32 %v1830_v32, 0.0  ;;  %v1714_v33 = vpop.f32.mrf.mxu1 }
 0x403   : > { %v2796_v50 = vpop.eup %2795  ;;  %v1654_v51 = vmul.f32 %v2794_v41, %v1583_v13  ;;  %v1656_v52 = vperm.slane %v2794_v41, 0  ;;  %v1717_v53 = vadd.f32 %v1714_v33, %v3376_v29  ;;  %v3552_v54 = vpop.f32.mrf.mxu3 }
 0x404   : > { %v1659_v56 = vperm.slane %v2796_v50, 0  ;;  %1849 = vmatpush.msrb.mxu0 %v1834_v9  ;;  %v3559_v8 = vpop.eup %2797  ;;  %v2647_v9 = vld [vmem:[%s3124_s15 + $0x78] sm:$0xff]  ;;  %s2371_s15 = scalar_lea.sflag [#allocation4], %s3120_s21 }
 0x405   : > { %v1655_v55 = vadd.f32 %v2796_v50, %v1654_v51  ;;  %v1657_v37 = vmul.f32 %v1656_v52, %v1590_v19  ;;  %v1658_v57 = vmul.f32 %v1656_v52, %v1591_v40  ;;  %v1718_v0 = vmax.f32 %v1717_v53, 0.0  ;;  %v3561_v5 = vpop.eup %2799 }
 0x406   : > { %v1660_v4 = vmul.f32 %v1659_v56, %v1636_v62  ;;  %v1661_v7 = vmul.f32 %v1659_v56, %v1639_v58  ;;  %1850 = vmatpush.msrb.mxu0 %v1833_v46  ;;  %v2288_v15 = vmul.f32 %v3559_v8, %v3547_v48  ;;  %v2273_v19 = vmul.f32 %v3561_v5, %v3549_v45 }
 0x407   : > { %v1719_v1 = vmax.f32 %v1647_v30, %v1718_v0  ;;  %2626 = vmatmul.msk.f32.vlgmr.msrb.gmra.mxu0 %vm494_vm1, %v3295_v26  ;;  %vm2293_vm7 = vweird.f32 %v3559_v8  ;;  %vm2278_vm9 = vweird.f32 %v3561_v5 }
 0x408   : > { %v1662_v20 = vadd.f32 %v1660_v4, %v1657_v37  ;;  %v1663_v61 = vadd.f32 %v1661_v7, %v1658_v57  ;;  %2041 = vmatpush.msra.mxu0 %v2641_v59  ;;  %v2289_v62 = vsub.f32 1.0, %v2288_v15  ;;  %v2296_v37 = vand.u32 2147483647, %v3547_v48  ;;  %vm3591_vm10 = vmor %vm2292_vm6, %vm2293_vm7  ;;  %v3617_v15 = vld [vmem:[%s3856_s8 + $0x8] sm:$0xff] }
 0x409   : > { %v1720_v2 = vsub.f32 %v1647_v30, %v1719_v1  ;;  %v1723_v49 = vsub.f32 %v1718_v0, %v1719_v1  ;;  %v2274_v30 = vsub.f32 1.0, %v2273_v19  ;;  %vm3608_vm11 = vmor %vm2277_vm8, %vm2278_vm9 }
 0x40a   : > { %v1899_v6 = vpop.f32.mrf.mxu1  ;;  %v2290_v34 = vmul.f32 %v3559_v8, %v2289_v62  ;;  %vm2297_vm12 = vcmp.eq.f32.partialorder %v2296_v37, 8.507059e+37 }
 0x40b   : > { %v1721_v10 = vmul.f32 1.442695, %v1720_v2  ;;  %v1724_v11 = vmul.f32 1.442695, %v1723_v49  ;;  %v1786_v13 = vpop.f32.mrf.mxu3  ;;  %v1905_v24 = vmax.f32 %v1899_v6, 0.0  ;;  %v2275_v51 = vmul.f32 %v3561_v5, %v2274_v30 }
 0x40c   : > { %v1789_v63 = vadd.f32 %v1786_v13, %v3376_v29  ;;  %v2291_v56 = vadd.f32 %v3559_v8, %v2290_v34  ;;  %v2281_v2 = vand.u32 2147483647, %v3549_v45 }
 0x40d   : > { %2801 = vpow2.f32 %v1721_v10  ;;  %v2276_v57 = vadd.f32 %v3561_v5, %v2275_v51  ;;  %v2863_v10 = vld [vmem:[%s3855_s7] sm:$0xff] }
 0x40e   : > { %2803 = vpow2.f32 %v1724_v11  ;;  %v1790_v14 = vmax.f32 %v1789_v63, 0.0  ;;  %vm2282_vm13 = vcmp.eq.f32.partialorder %v2281_v2, 8.507059e+37 }
 0x40f   : > { %2627 = vmatmul.msk.f32.gmra.mxu0 %vm494_vm1, %v3304_v17 }
 0x410   : > { %v3570_v40 = vmax.f32 %v1719_v1, %v1790_v14 }
 0x412   : > { %v1792_v58 = vsub.f32 %v1719_v1, %v3570_v40  ;;  %v1795_v16 = vsub.f32 %v1790_v14, %v3570_v40  ;;  %v1902_v21 = vpop.f32.mrf.mxu1  ;;  %v2283_v1 = vand.u32 2147483648, %v3549_v45  ;;  %v2280_v45 = vsel %vm3608_vm11, %v3561_v5, %v2276_v57  ;;  %v2866_v5 = vld [vmem:[%s3855_s7 + $0x8] sm:$0xff] }
 0x413   : > { %v2802_v23 = vpop.eup %2801  ;;  %v1906_v25 = vmax.f32 %v1902_v21, 0.0  ;;  %v1971_v28 = vpop.f32.mrf.mxu3 }
 0x414   : > { %v2804_v60 = vpop.eup %2803  ;;  %v1726_v18 = vmul.f32 %v2802_v23, %v1655_v55  ;;  %v1728_v31 = vperm.slane %v2802_v23, 0  ;;  %v1793_v17 = vmul.f32 1.442695, %v1792_v58  ;;  %v1796_v35 = vmul.f32 1.442695, %v1795_v16 }
 0x415   : > { %v1731_v43 = vperm.slane %v2804_v60, 0  ;;  %1921 = vmatpush.msrb.mxu2 %v1906_v25  ;;  %v2284_v14 = vor.u32 1.1754944e-38, %v2283_v1  ;;  %v3638_v16 = vld [vmem:[%s3856_s8 + $0x10] sm:$0x1] }
 0x416   : > { %v1727_v32 = vadd.f32 %v2804_v60, %v1726_v18  ;;  %v1729_v41 = vmul.f32 %v1728_v31, %v1662_v20  ;;  %v1730_v46 = vmul.f32 %v1728_v31, %v1663_v61  ;;  %2805 = vpow2.f32 %v1793_v17 }
 0x417   : > { %v1732_v33 = vmul.f32 %v1731_v43, %v3537_v12  ;;  %v1733_v50 = vmul.f32 %v1731_v43, %v3543_v44  ;;  %2807 = vpow2.f32 %v1796_v35  ;;  %2628 = vmatmul.msk.f32.gmra.mxu0 %vm494_vm1, %v3316_v22  ;;  %1922 = vmatpush.msrb.mxu2 %v1905_v24  ;;  %v2298_v44 = vand.u32 2147483648, %v3547_v48 }
 0x418   : > { %2632 = vmatmul.msk.f32.vlgmr.msrb.gmra.mxu2 %vm494_vm1, %v3295_v26  ;;  %v1977_v26 = vmax.f32 %v1971_v28, 0.0  ;;  %v2295_v61 = vsel %vm3591_vm10, %v3559_v8, %v2291_v56  ;;  %v2285_v58 = vsel %vm2282_vm13, %v2284_v14, %v2280_v45 }
 0x419   : > { %v1734_v52 = vadd.f32 %v1732_v33, %v1729_v41  ;;  %v1735_v53 = vadd.f32 %v1733_v50, %v1730_v46  ;;  %2113 = vmatpush.msra.mxu2 %v2647_v9  ;;  %v2299_v11 = vor.u32 1.1754944e-38, %v2298_v44 }
 0x41b   : > { %v1974_v12 = vpop.f32.mrf.mxu3 }
 0x41c   : > { %v2806_v22 = vpop.eup %2805  ;;  %v1978_v55 = vmax.f32 %v1974_v12, 0.0 }
 0x41d   : > { %v2808_v0 = vpop.eup %2807  ;;  %v1798_v59 = vmul.f32 %v2806_v22, %v1727_v32  ;;  %v1800_v4 = vperm.slane %v2806_v22, 0 }
 0x41e   : > { %v1803_v20 = vperm.slane %v2808_v0, 0  ;;  %1993 = vmatpush.msrb.mxu1 %v1978_v55 }
 0x41f   : > { %v1799_v48 = vadd.f32 %v2808_v0, %v1798_v59  ;;  %v1801_v49 = vmul.f32 %v1800_v4, %v1734_v52  ;;  %v1802_v6 = vmul.f32 %v1800_v4, %v1735_v53  ;;  %2642 = vmatmul.msk.f32.vlgmr.msra.gmra.mxu0 %vm674_vm0, %v2863_v10 }
 0x420   : > { %v1804_v8 = vmul.f32 %v1803_v20, %v3545_v47  ;;  %v1805_v63 = vmul.f32 %v1803_v20, %v3552_v54  ;;  %1994 = vmatpush.msrb.mxu1 %v1977_v26  ;;  %2633 = vmatmul.msk.f32.gmra.mxu2 %vm494_vm1, %v3617_v15  ;;  %v3627_v47 = vld [vmem:[%s3856_s8] sm:$0xff]  ;;  %v2300_v54 = vsel %vm2297_vm12, %v2299_v11, %v2295_v61 }
 0x421   : > { %2638 = vmatmul.msk.f32.vlgmr.msrb.gmra.mxu1 %vm494_vm1, %v3627_v47 }
 0x422   : > { %v1806_v19 = vadd.f32 %v1804_v8, %v1801_v49  ;;  %v1807_v62 = vadd.f32 %v1805_v63, %v1802_v6  ;;  %2321 = vmatpush.msra.mxu1 %v2300_v54 }
 0x424   : > { %2322 = vmatpush.msra.mxu1 %v2285_v58 }
 0x427   : > { %2643 = vmatmul.msk.f32.gmra.mxu0 %vm674_vm0, %v2866_v5 }
 0x428   : > { %2634 = vmatmul.msk.f32.gmra.mxu2 %vm494_vm1, %v3638_v16 }
 0x429   : > { %2639 = vmatmul.msk.f32.gmra.mxu1 %vm494_vm1, %v3617_v15 }
 0x430   : > { %2648 = vmatmul.msk.f32.vlgmr.msra.gmra.mxu2 %vm674_vm0, %v2863_v10 }
 0x431   : > { %2640 = vmatmul.msk.f32.gmra.mxu1 %vm494_vm1, %v3638_v16 }
 0x438   : > { %2649 = vmatmul.msk.f32.gmra.mxu2 %vm674_vm0, %v2866_v5 }
 0x484   : > { %v1852_v21 = vpop.f32.mrf.mxu0 }
 0x48c   : > { %v1855_v23 = vpop.f32.mrf.mxu0 }
 0x494   : > { %v1858_v25 = vpop.f32.mrf.mxu0 }
 0x495   : > { %v1861_v28 = vadd.f32 %v1858_v25, %v3376_v29 }
 0x497   : > { %v1862_v30 = vmax.f32 %v1861_v28, 0.0 }
 0x499   : > { %v1863_v60 = vmax.f32 %v3570_v40, %v1862_v30 }
 0x49b   : > { %v1864_v18 = vsub.f32 %v3570_v40, %v1863_v60  ;;  %v1867_v31 = vsub.f32 %v1862_v30, %v1863_v60  ;;  %v3651_v17 = vpop.f32.mrf.mxu2 }
 0x49c   : > { %v2043_v35 = vpop.f32.mrf.mxu0 }
 0x49d   : > { %v1865_v43 = vmul.f32 1.442695, %v1864_v18  ;;  %v1868_v24 = vmul.f32 1.442695, %v1867_v31  ;;  %v2049_v9 = vmax.f32 %v2043_v35, 0.0 }
 0x49e   : > { %v3653_v34 = vpop.f32.mrf.mxu1 }
 0x49f   : > { %2809 = vpow2.f32 %v1865_v43 }
 0x4a0   : > { %2811 = vpow2.f32 %v1868_v24 }
 0x4a3   : > { %v1927_v32 = vpop.f32.mrf.mxu2 }
 0x4a4   : > { %v2046_v41 = vpop.f32.mrf.mxu0 }
 0x4a5   : > { %v2810_v46 = vpop.eup %2809  ;;  %v2050_v33 = vmax.f32 %v2046_v41, 0.0 }
 0x4a6   : > { %v2812_v50 = vpop.eup %2811  ;;  %v1870_v51 = vmul.f32 %v2810_v46, %v1799_v48  ;;  %v1872_v52 = vperm.slane %v2810_v46, 0  ;;  %v1999_v53 = vpop.f32.mrf.mxu1 }
 0x4a7   : > { %v1875_v40 = vperm.slane %v2812_v50, 0  ;;  %2065 = vmatpush.msrb.mxu3 %v2050_v33 }
 0x4a8   : > { %v1871_v56 = vadd.f32 %v2812_v50, %v1870_v51  ;;  %v1873_v12 = vmul.f32 %v1872_v52, %v1806_v19  ;;  %v1874_v44 = vmul.f32 %v1872_v52, %v1807_v62 }
 0x4a9   : > { %v1876_v22 = vmul.f32 %v1875_v40, %v1852_v21  ;;  %v1877_v26 = vmul.f32 %v1875_v40, %v1855_v23  ;;  %2066 = vmatpush.msrb.mxu3 %v2049_v9 }
 0x4aa   : > { %2644 = vmatmul.msk.f32.vlgmr.msrb.gmra.mxu3 %vm494_vm1, %v3627_v47 }
 0x4ab   : > { %v1878_v55 = vadd.f32 %v1876_v22, %v1873_v12  ;;  %v1879_v37 = vadd.f32 %v1877_v26, %v1874_v44  ;;  %v1930_v57 = vpop.f32.mrf.mxu2  ;;  %v2528_v12 = vmul.f32 -1.442695, %v3334_v27  ;;  %v2530_v27 = vmul.f32 -1.442695, %v3338_v39 }
 0x4ac   : > { %v1933_v0 = vadd.f32 %v1930_v57, %v3376_v29 }
 0x4ae   : > { %v1934_v59 = vmax.f32 %v1933_v0, 0.0  ;;  %v2002_v4 = vpop.f32.mrf.mxu1 }
 0x4af   : > { %v2005_v7 = vadd.f32 %v2002_v4, %v3376_v29 }
 0x4b0   : > { %v1935_v1 = vmax.f32 %v1863_v60, %v1934_v59 }
 0x4b1   : > { %v2006_v20 = vmax.f32 %v2005_v7, 0.0  ;;  %v2531_v7 = vmul.f32 -1.442695, %v3340_v42 }
 0x4b2   : > { %v1936_v61 = vsub.f32 %v1863_v60, %v1935_v1  ;;  %v1939_v2 = vsub.f32 %v1934_v59, %v1935_v1  ;;  %2645 = vmatmul.msk.f32.gmra.mxu3 %vm494_vm1, %v3617_v15 }
 0x4b3   : > { %v3661_v48 = vmax.f32 %v1935_v1, %v2006_v20  ;;  %v2115_v49 = vpop.f32.mrf.mxu2 }
 0x4b4   : > { %v1937_v6 = vmul.f32 1.442695, %v1936_v61  ;;  %v1940_v10 = vmul.f32 1.442695, %v1939_v2  ;;  %v2121_v21 = vmax.f32 %v2115_v49, 0.0 }
 0x4b5   : > { %v2008_v11 = vsub.f32 %v1935_v1, %v3661_v48  ;;  %v2011_v13 = vsub.f32 %v2006_v20, %v3661_v48 }
 0x4b6   : > { %2813 = vpow2.f32 %v1937_v6 }
 0x4b7   : > { %2815 = vpow2.f32 %v1940_v10  ;;  %v2009_v8 = vmul.f32 1.442695, %v2008_v11  ;;  %v2012_v63 = vmul.f32 1.442695, %v2011_v13 }
 0x4b9   : > { %2817 = vpow2.f32 %v2009_v8 }
 0x4ba   : > { %2819 = vpow2.f32 %v2012_v63  ;;  %2646 = vmatmul.msk.f32.gmra.mxu3 %vm494_vm1, %v3638_v16 }
 0x4bb   : > { %v2118_v45 = vpop.f32.mrf.mxu2 }
 0x4bc   : > { %v2814_v54 = vpop.eup %2813  ;;  %v2122_v14 = vmax.f32 %v2118_v45, 0.0 }
 0x4bd   : > { %v2816_v19 = vpop.eup %2815  ;;  %v1942_v62 = vmul.f32 %v2814_v54, %v1871_v56  ;;  %v1944_v58 = vperm.slane %v2814_v54, 0 }
 0x4be   : > { %v1947_v5 = vperm.slane %v2816_v19, 0  ;;  %2137 = vmatpush.msrb.mxu0 %v2122_v14 }
 0x4bf   : > { %v2818_v23 = vpop.eup %2817  ;;  %v1943_v25 = vadd.f32 %v2816_v19, %v1942_v62  ;;  %v1945_v28 = vmul.f32 %v1944_v58, %v1878_v55  ;;  %v1946_v30 = vmul.f32 %v1944_v58, %v1879_v37 }
 0x4c0   : > { %v2820_v60 = vpop.eup %2819  ;;  %v1948_v18 = vmul.f32 %v1947_v5, %v3651_v17  ;;  %v1949_v31 = vmul.f32 %v1947_v5, %v1927_v32  ;;  %2138 = vmatpush.msrb.mxu0 %v2121_v21  ;;  %v2016_v46 = vperm.slane %v2818_v23, 0 }
 0x4c1   : > { %v2014_v35 = vmul.f32 %v2818_v23, %v1943_v25  ;;  %v2019_v43 = vperm.slane %v2820_v60, 0  ;;  %2650 = vmatmul.msk.f32.vlgmr.msrb.gmra.mxu0 %vm494_vm1, %v3627_v47  ;;  %v2529_v47 = vmul.f32 -1.442695, %v3336_v38 }
 0x4c2   : > { %v1950_v24 = vadd.f32 %v1948_v18, %v1945_v28  ;;  %v1951_v41 = vadd.f32 %v1949_v31, %v1946_v30 }
 0x4c3   : > { %v2015_v9 = vadd.f32 %v2820_v60, %v2014_v35  ;;  %v2020_v51 = vmul.f32 %v2019_v43, %v3653_v34  ;;  %v2021_v52 = vmul.f32 %v2019_v43, %v1999_v53  ;;  %2821 = vpow2.f32 %v2529_v47 }
 0x4c4   : > { %v2017_v33 = vmul.f32 %v2016_v46, %v1950_v24  ;;  %v2018_v50 = vmul.f32 %v2016_v46, %v1951_v41  ;;  %2823 = vpow2.f32 %v2528_v12 }
 0x4c6   : > { %v2022_v40 = vadd.f32 %v2020_v51, %v2017_v33  ;;  %v2023_v56 = vadd.f32 %v2021_v52, %v2018_v50 }
 0x4c9   : > { %2651 = vmatmul.msk.f32.gmra.mxu0 %vm494_vm1, %v3617_v15  ;;  %v2822_v22 = vpop.eup %2821 }
 0x4ca   : > { %v2824_v26 = vpop.eup %2823  ;;  %v3680_v15 = vadd.f32 1.0, %v2822_v22 }
 0x4cb   : > { %v3683_v37 = vadd.f32 1.0, %v2824_v26 }
 0x4cc   : > { %2825 = vrcp.f32 %v3680_v15  ;;  %vm576_vm14 = vweird.f32 %v3680_v15  ;;  %v582_v24 = vand.u32 2147483648, %v3680_v15  ;;  %v580_v46 = vand.u32 2147483647, %v3680_v15 }
 0x4cd   : > { %2827 = vrcp.f32 %v3683_v37  ;;  %vm561_vm0 = vweird.f32 %v3683_v37  ;;  %v567_v51 = vand.u32 2147483648, %v3683_v37 }
 0x4ce   : > { %vm581_vm5 = vcmp.eq.f32.partialorder %v580_v46, 8.507059e+37 }
 0x4cf   : > { %v568_v22 = vor.u32 1.1754944e-38, %v567_v51 }
 0x4d1   : > { %2652 = vmatmul.msk.f32.gmra.mxu0 %vm494_vm1, %v3638_v16 }
 0x4d2   : > { %v3692_v1 = vpop.eup %2825 }
 0x4d3   : > { %v3694_v20 = vpop.eup %2827  ;;  %v572_v39 = vmul.f32 %v3692_v1, %v3680_v15  ;;  %vm577_vm15 = vweird.f32 %v3692_v1 }
 0x4d4   : > { %v557_v42 = vmul.f32 %v3694_v20, %v3683_v37  ;;  %vm562_vm2 = vweird.f32 %v3694_v20  ;;  %vm3717_vm3 = vmor %vm576_vm14, %vm577_vm15 }
 0x4d5   : > { %v573_v19 = vsub.f32 1.0, %v572_v39  ;;  %vm3725_vm4 = vmor %vm561_vm0, %vm562_vm2 }
 0x4d6   : > { %v558_v23 = vsub.f32 1.0, %v557_v42 }
 0x4d7   : > { %v574_v18 = vmul.f32 %v3692_v1, %v573_v19 }
 0x4d8   : > { %v559_v43 = vmul.f32 %v3694_v20, %v558_v23 }
 0x4d9   : > { %v575_v41 = vadd.f32 %v3692_v1, %v574_v18 }
 0x4da   : > { %v560_v50 = vadd.f32 %v3694_v20, %v559_v43 }
 0x4db   : > { %v579_v47 = vsel %vm3717_vm3, %v3692_v1, %v575_v41 }
 0x52d   : > { %v2068_v17 = vpop.f32.mrf.mxu3 }
 0x535   : > { %v2071_v32 = vpop.f32.mrf.mxu3 }
 0x53d   : > { %v2074_v44 = vpop.f32.mrf.mxu3 }
 0x53e   : > { %v2077_v34 = vadd.f32 %v2074_v44, %v3376_v29  ;;  %v3678_v53 = vpop.f32.mrf.mxu0  ;;  %v564_v44 = vsel %vm3725_vm4, %v3694_v20, %v560_v50 }
 0x540   : > { %v2078_v55 = vmax.f32 %v2077_v34, 0.0 }
 0x542   : > { %v2079_v16 = vmax.f32 %v3661_v48, %v2078_v55 }
 0x544   : > { %v2080_v38 = vsub.f32 %v3661_v48, %v2079_v16  ;;  %v2083_v57 = vsub.f32 %v2078_v55, %v2079_v16 }
 0x546   : > { %v2081_v0 = vmul.f32 1.442695, %v2080_v38  ;;  %v2084_v59 = vmul.f32 1.442695, %v2083_v57  ;;  %v3688_v4 = vpop.f32.mrf.mxu0 }
 0x548   : > { %2829 = vpow2.f32 %v2081_v0 }
 0x549   : > { %2831 = vpow2.f32 %v2084_v59 }
 0x54a   : > { %2833 = vpow2.f32 %v2530_v27 }
 0x54b   : > { %2835 = vpow2.f32 %v2531_v7 }
 0x54e   : > { %v2830_v61 = vpop.eup %2829  ;;  %v2146_v2 = vpop.f32.mrf.mxu0 }
 0x54f   : > { %v2832_v48 = vpop.eup %2831  ;;  %v2086_v49 = vmul.f32 %v2830_v61, %v2015_v9  ;;  %v2088_v6 = vperm.slane %v2830_v61, 0  ;;  %v2149_v10 = vadd.f32 %v2146_v2, %v3376_v29  ;;  %v565_v9 = vand.u32 2147483647, %v3683_v37 }
 0x550   : > { %v2834_v11 = vpop.eup %2833  ;;  %v2091_v13 = vperm.slane %v2832_v48, 0 }
 0x551   : > { %v2836_v8 = vpop.eup %2835  ;;  %v2087_v63 = vadd.f32 %v2832_v48, %v2086_v49  ;;  %v2089_v45 = vmul.f32 %v2088_v6, %v2022_v40  ;;  %v2090_v54 = vmul.f32 %v2088_v6, %v2023_v56  ;;  %v2150_v14 = vmax.f32 %v2149_v10, 0.0 }
 0x552   : > { %v2092_v62 = vmul.f32 %v2091_v13, %v2068_v17  ;;  %v2093_v58 = vmul.f32 %v2091_v13, %v2071_v32  ;;  %v3701_v5 = vadd.f32 1.0, %v2834_v11  ;;  %v3703_v25 = vadd.f32 1.0, %v2836_v8 }
 0x553   : > { %v2151_v21 = vmax.f32 %v2079_v16, %v2150_v14  ;;  %v583_v56 = vor.u32 1.1754944e-38, %v582_v24  ;;  %vm566_vm6 = vcmp.eq.f32.partialorder %v565_v9, 8.507059e+37 }
 0x554   : > { %v2094_v29 = vadd.f32 %v2092_v62, %v2089_v45  ;;  %v2095_v28 = vadd.f32 %v2093_v58, %v2090_v54  ;;  %2837 = vrcp.f32 %v3701_v5  ;;  %v569_v7 = vsel %vm566_vm6, %v568_v22, %v564_v44 }
 0x555   : > { %v2152_v30 = vsub.f32 %v2079_v16, %v2151_v21  ;;  %v2155_v60 = vsub.f32 %v2150_v14, %v2151_v21  ;;  %2839 = vrcp.f32 %v3703_v25  ;;  %v584_v55 = vsel %vm581_vm5, %v583_v56, %v579_v47 }
 0x556   : > { %v587_v1 = vsub.f32 1.0, %v584_v55  ;;  %v586_v49 = vsub.f32 1.0, %v569_v7  ;;  %vm601_vm7 = vweird.f32 %v3701_v5  ;;  %vm616_vm9 = vweird.f32 %v3703_v25 }
 0x557   : > { %v2153_v31 = vmul.f32 1.442695, %v2152_v30  ;;  %v2156_v35 = vmul.f32 1.442695, %v2155_v60  ;;  %v607_v13 = vand.u32 2147483648, %v3701_v5 }
 0x558   : > { %v994_v48 = vmul.f32 %v3411_v3, %v587_v1  ;;  %v605_v3 = vand.u32 2147483647, %v3701_v5  ;;  %v620_v8 = vand.u32 2147483647, %v3703_v25 }
 0x559   : > { %2841 = vpow2.f32 %v2153_v31  ;;  %v608_v23 = vor.u32 1.1754944e-38, %v607_v13 }
 0x55a   : > { %2843 = vpow2.f32 %v2156_v35  ;;  %v3723_v52 = vpop.eup %2837  ;;  %v2654_v42 = vmul.f32 -1.442695, %v994_v48  ;;  %vm606_vm14 = vcmp.eq.f32.partialorder %v605_v3, 8.507059e+37  ;;  %vm621_vm15 = vcmp.eq.f32.partialorder %v620_v8, 8.507059e+37 }
 0x55b   : > { %v3729_v17 = vpop.eup %2839  ;;  %v597_v15 = vmul.f32 %v3723_v52, %v3701_v5  ;;  %vm602_vm8 = vweird.f32 %v3723_v52 }
 0x55c   : > { %v612_v16 = vmul.f32 %v3729_v17, %v3703_v25  ;;  %vm617_vm10 = vweird.f32 %v3729_v17  ;;  %vm3756_vm11 = vmor %vm601_vm7, %vm602_vm8 }
 0x55d   : > { %v598_v20 = vsub.f32 1.0, %v597_v15  ;;  %vm3761_vm12 = vmor %vm616_vm9, %vm617_vm10 }
 0x55e   : > { %v613_v61 = vsub.f32 1.0, %v612_v16 }
 0x55f   : > { %v2842_v32 = vpop.eup %2841  ;;  %v599_v6 = vmul.f32 %v3723_v52, %v598_v20 }
 0x560   : > { %v2844_v12 = vpop.eup %2843  ;;  %v2158_v34 = vmul.f32 %v2842_v32, %v2087_v63  ;;  %v2160_v26 = vperm.slane %v2842_v32, 0  ;;  %v614_v10 = vmul.f32 %v3729_v17, %v613_v61  ;;  %v622_v63 = vand.u32 2147483648, %v3703_v25 }
 0x561   : > { %v2163_v37 = vperm.slane %v2844_v12, 0  ;;  %v600_v45 = vadd.f32 %v3723_v52, %v599_v6 }
 0x562   : > { %v2159_v38 = vadd.f32 %v2844_v12, %v2158_v34  ;;  %v2161_v57 = vmul.f32 %v2160_v26, %v2094_v29  ;;  %v2162_v27 = vmul.f32 %v2160_v26, %v2095_v28  ;;  %v623_v25 = vor.u32 1.1754944e-38, %v622_v63 }
 0x563   : > { %v2164_v0 = vmul.f32 %v2163_v37, %v3678_v53  ;;  %v2165_v59 = vmul.f32 %v2163_v37, %v3688_v4  ;;  %v993_v53 = vmul.f32 %v3408_v36, %v586_v49  ;;  %v615_v36 = vadd.f32 %v3729_v17, %v614_v10 }
 0x564   : > { %2845 = vrcp.f32 %v2159_v38  ;;  %v2179_v62 = vand.u32 2147483648, %v2159_v38  ;;  %v2177_v21 = vand.u32 2147483647, %v2159_v38  ;;  %v604_v29 = vsel %vm3756_vm11, %v3723_v52, %v600_v45 }
 0x565   : > { %v2166_v39 = vadd.f32 %v2164_v0, %v2161_v57  ;;  %v2167_v2 = vadd.f32 %v2165_v59, %v2162_v27  ;;  %v2653_v58 = vmul.f32 -1.442695, %v993_v53  ;;  %2847 = vpow2.f32 %v2654_v42 }
 0x566   : > { %v619_v28 = vsel %vm3761_vm12, %v3729_v17, %v615_v36  ;;  %vm2173_vm0 = vweird.f32 %v2159_v38  ;;  %v2180_v60 = vor.u32 1.1754944e-38, %v2179_v62  ;;  %vm2178_vm3 = vcmp.eq.f32.partialorder %v2177_v21, 8.507059e+37 }
 0x567   : > { %2849 = vpow2.f32 %v2653_v58  ;;  %v609_v31 = vsel %vm606_vm14, %v608_v23, %v604_v29  ;;  %v624_v35 = vsel %vm621_vm15, %v623_v25, %v619_v28  ;;  %v2302_v29 = vld [vmem:[%s3857_s9] sm:$0xff] }
 0x568   : > { %v626_v46 = vsub.f32 1.0, %v609_v31  ;;  %v627_v9 = vsub.f32 1.0, %v624_v35 }
 0x56a   : > { %v2846_v11 = vpop.eup %2845 }
 0x56b   : > { %v2169_v4 = vmul.f32 %v2846_v11, %v2159_v38  ;;  %vm2174_vm13 = vweird.f32 %v2846_v11  ;;  %v2848_v24 = vpop.eup %2847 }
 0x56c   : > { %vm2175_vm2 = vmor %vm2173_vm0, %vm2174_vm13  ;;  %v3771_v51 = vadd.f32 1.0, %v2848_v24  ;;  %v2337_v24 = vld [vmem:[%s3858_s10 + $0x8] sm:$0xff] }
 0x56d   : > { %v2170_v14 = vsub.f32 1.0, %v2169_v4  ;;  %v2850_v52 = vpop.eup %2849 }
 0x56e   : > { %2851 = vrcp.f32 %v3771_v51  ;;  %v3774_v32 = vadd.f32 1.0, %v2850_v52  ;;  %vm2216_vm4 = vweird.f32 %v3771_v51  ;;  %v2222_v13 = vand.u32 2147483648, %v3771_v51 }
 0x56f   : > { %v2171_v5 = vmul.f32 %v2846_v11, %v2170_v14 }
 0x570   : > { %v2207_v14 = vand.u32 2147483648, %v3774_v32  ;;  %vm2201_vm0 = vweird.f32 %v3774_v32  ;;  %v2205_v62 = vand.u32 2147483647, %v3774_v32 }
 0x571   : > { %v2172_v30 = vadd.f32 %v2846_v11, %v2171_v5  ;;  %v2223_v5 = vor.u32 1.1754944e-38, %v2222_v13 }
 0x572   : > { %v2208_v25 = vor.u32 1.1754944e-38, %v2207_v14 }
 0x573   : > { %v2176_v18 = vsel %vm2175_vm2, %v2846_v11, %v2172_v30  ;;  %v2303_v30 = vld [vmem:[%s3857_s9 + $0x8] sm:$0xff] }
 0x574   : > { %v2181_v43 = vsel %vm2178_vm3, %v2180_v60, %v2176_v18  ;;  %v2852_v12 = vpop.eup %2851 }
 0x575   : > { %v2183_v41 = vperm.slane %v2181_v43, 0  ;;  %v2212_v15 = vmul.f32 %v2852_v12, %v3771_v51  ;;  %vm2217_vm7 = vweird.f32 %v2852_v12  ;;  %v2336_v43 = vld [vmem:[%s3858_s10] sm:$0xff] }
 0x576   : > { %vm2218_vm14 = vmor %vm2216_vm4, %vm2217_vm7  ;;  %vm2206_vm4 = vcmp.eq.f32.partialorder %v2205_v62, 8.507059e+37 }
 0x577   : > { %v2184_v33 = vmul.f32 %v2183_v41, %v2166_v39  ;;  %v2185_v50 = vmul.f32 %v2183_v41, %v2167_v2  ;;  %v2213_v37 = vsub.f32 1.0, %v2212_v15  ;;  %v2220_v39 = vand.u32 2147483647, %v3771_v51 }
 0x579   : > { %v2186_v40 = vmul.f32 %v2184_v33, %v626_v46  ;;  %v2187_v56 = vmul.f32 %v2185_v50, %v627_v9  ;;  %v2214_v1 = vmul.f32 %v2852_v12, %v2213_v37  ;;  %vm2221_vm3 = vcmp.eq.f32.partialorder %v2220_v39, 8.507059e+37 }
 0x57b   : > { %v2656_v17 = vmul.f32 -1.442695, %v2187_v56  ;;  %v2655_v47 = vmul.f32 -1.442695, %v2186_v40  ;;  %v2215_v4 = vadd.f32 %v2852_v12, %v2214_v1 }
 0x57d   : > { %2853 = vpow2.f32 %v2656_v17  ;;  %v2219_v19 = vsel %vm2218_vm14, %v2852_v12, %v2215_v4 }
 0x57e   : > { %2855 = vpow2.f32 %v2655_v47  ;;  %v2224_v23 = vsel %vm2221_vm3, %v2223_v5, %v2219_v19 }
 0x57f   : > { %2857 = vrcp.f32 %v3774_v32 }
 0x583   : > { %v2854_v44 = vpop.eup %2853 }
 0x584   : > { %v2856_v22 = vpop.eup %2855  ;;  %v2233_v34 = vadd.f32 1.0, %v2854_v44 }
 0x585   : > { %v2232_v26 = vadd.f32 1.0, %v2856_v22  ;;  %v3777_v55 = vpop.eup %2857 }
 0x586   : > { %2859 = vrcp.f32 %v2233_v34  ;;  %v2197_v16 = vmul.f32 %v3777_v55, %v3774_v32  ;;  %v2260_v20 = vand.u32 2147483648, %v2233_v34  ;;  %v2258_v48 = vand.u32 2147483647, %v2233_v34 }
 0x587   : > { %2861 = vrcp.f32 %v2232_v26  ;;  %v2245_v10 = vand.u32 2147483648, %v2232_v26  ;;  %vm2254_vm8 = vweird.f32 %v2233_v34  ;;  %v2243_v53 = vand.u32 2147483647, %v2232_v26 }
 0x588   : > { %v2198_v0 = vsub.f32 1.0, %v2197_v16  ;;  %v2261_v42 = vor.u32 1.1754944e-38, %v2260_v20  ;;  %vm2239_vm10 = vweird.f32 %v2232_v26  ;;  %vm2259_vm11 = vcmp.eq.f32.partialorder %v2258_v48, 8.507059e+37 }
 0x589   : > { %vm2202_vm13 = vweird.f32 %v3777_v55  ;;  %v2246_v36 = vor.u32 1.1754944e-38, %v2245_v10  ;;  %vm2244_vm15 = vcmp.eq.f32.partialorder %v2243_v53, 8.507059e+37 }
 0x58a   : > { %v2199_v49 = vmul.f32 %v3777_v55, %v2198_v0  ;;  %vm2203_vm2 = vmor %vm2201_vm0, %vm2202_vm13 }
 0x58c   : > { %v2860_v38 = vpop.eup %2859  ;;  %v2200_v63 = vadd.f32 %v3777_v55, %v2199_v49 }
 0x58d   : > { %v2862_v57 = vpop.eup %2861  ;;  %v2250_v27 = vmul.f32 %v2860_v38, %v2233_v34  ;;  %vm2255_vm5 = vweird.f32 %v2860_v38 }
 0x58e   : > { %v2235_v59 = vmul.f32 %v2862_v57, %v2232_v26  ;;  %vm2240_vm6 = vweird.f32 %v2862_v57  ;;  %vm2256_vm9 = vmor %vm2254_vm8, %vm2255_vm5  ;;  %v2204_v21 = vsel %vm2203_vm2, %v3777_v55, %v2200_v63  ;;  %vm2304_vm5 = vcmask 392192  }
 0x58f   : > { %v2251_v7 = vsub.f32 1.0, %v2250_v27  ;;  %vm2241_vm12 = vmor %vm2239_vm10, %vm2240_vm6  ;;  %v2209_v28 = vsel %vm2206_vm4, %v2208_v25, %v2204_v21  ;;  %vm2367_vm6 = vcmask 523264  }
 0x590   : > { %v2236_v61 = vsub.f32 1.0, %v2235_v59 }
 0x591   : > { %v2252_v2 = vmul.f32 %v2860_v38, %v2251_v7 }
 0x592   : > { %v2237_v6 = vmul.f32 %v2862_v57, %v2236_v61 }
 0x593   : > { %v2253_v11 = vadd.f32 %v2860_v38, %v2252_v2 }
 0x594   : > { %v2238_v3 = vadd.f32 %v2862_v57, %v2237_v6 }
 0x595   : > { %v2257_v8 = vsel %vm2256_vm9, %v2860_v38, %v2253_v11 }
 0x596   : > { %v2262_v45 = vsel %vm2259_vm11, %v2261_v42, %v2257_v8  ;;  %v2242_v54 = vsel %vm2241_vm12, %v2862_v57, %v2238_v3 }
 0x597   : > { %2323 = vmatpush.msra.mxu1 %v2262_v45  ;;  %v2247_v58 = vsel %vm2244_vm15, %v2246_v36, %v2242_v54 }
 0x599   : > { %2324 = vmatpush.msra.mxu1 %v2247_v58 }
 0x59b   : > { %2325 = vmatpush.msra.mxu1 %v2224_v23 }
 0x59d   : > { %2326 = vmatpush.msra.mxu1 %v2209_v28 }
 0x59e   : > { %2659 = vmatmul.msk.f32.vlgmr.msra.gmra.mxu1 %vm2304_vm5, %v2302_v29 }
 0x5a6   : > { %2660 = vmatmul.msk.f32.gmra.mxu1 %vm2304_vm5, %v2303_v30 }
 0x61b   : > { %v2328_v60 = vpop.f32.mrf.mxu1 }
 0x61c   : > { %v2334_v35 = vmax.f32 %v2328_v60, 0.0 }
 0x623   : > { %v2331_v18 = vpop.f32.mrf.mxu1 }
 0x624   : > { %v2335_v31 = vmax.f32 %v2331_v18, 0.0 }
 0x626   : > { %2358 = vmatpush.msrb.mxu2 %v2335_v31 }
 0x628   : > { %2359 = vmatpush.msrb.mxu2 %v2334_v35 }
 0x629   : > { %2661 = vmatmul.msk.f32.vlgmr.msrb.gmra.mxu2 %vm494_vm1, %v2336_v43 }
 0x631   : > { %2662 = vmatmul.msk.f32.gmra.mxu2 %vm494_vm1, %v2337_v24 }
 0x6ac   : > { %v2361_v41 = vpop.f32.mrf.mxu2 }
 0x6ad   : > { %2368 = vst.msk [vmem:[%s469_s24] sm:$0xff] %vm2367_vm6, %v2361_v41 }
 0x6b4   : > { %v2364_v46 = vpop.f32.mrf.mxu2 }
 0x6b5   : > { %2369 = vst.msk [vmem:[%s469_s24 + $0x8] sm:$0xff] %vm2367_vm6, %v2364_v46 }
 0x6b6   : > { %2925 = shalt.err (!%p2922_p0)
}
 0x6b7   : > { %s2984_s21 = smov 128   ;;  %s2985_s24 = smov 8  }
 0x6b8   : > { %2675 = dma.vmem_to_hbm [thread:$0]  (%p3097_p9), %s2385_s23, 256, %s2387_s28, %s2371_s15, %s2984_s21, %s2984_s21, %s2985_s24  }
 0x6b9 PF: > { %s3890_s12 = sld [smem:[#allocation8_spill]]  ;;  %p2682_p1 = pnand %p2511_p12, %p3104_p11 }
 0x6bb   : > { %p2683_p2 = pneg %p2682_p1 }
 0x6bf   : > { %s2401_s16 = sand.u32 1, %s3890_s12  }
 0x6c0   : > { %s2402_s20 = scalar_lea.sflag [#allocation4], %s2401_s16 }
 0x6c1   : > { %2955 = dma.done.wait (%p2683_p2), %s2402_s20, 256  }
 0x6c2   : > { %2957 = vsyncadd (%p2683_p2), %s2402_s20, 4294967040  ;;  %s27_s22 = sadd.s32 1, %s2980_s22   ;;  %s3891_s29 = sld [smem:[#allocation12_spill]] }
 0x6c3   : > { %p24_p3 = scmp.ge.s32.totalorder %s27_s22, 4   ;;  %s3892_s20 = sld [smem:[#allocation9_spill]] }
 0x6c4   : > { %s3893_s21 = sld [smem:[#allocation10_spill]]  ;;  %s3894_s17 = smov %s2964_s18 }
 0x6c5   : > { %s3895_s18 = smov %s2968_s19  ;;  %26 = sbr.rel (!%p24_p3) target bundleno = 8 (0x8), region = 133 }
 0x6c8   : > { %s3896_s19 = smov %s3891_s29 }
 0x6ca   :  { %2408 = vsyncpa [#allocation3], 1 }
 0x6cb   :  { %2410 = vsyncpa [#allocation3 + $0x1], 1 }
 0x6cc   :  { %2411 = vsyncpa [#allocation4], 1 }
 0x6cd   :  { %2413 = vsyncpa [#allocation4 + $0x1], 1 }

</bundles_post_ra>
